<compile_context>
chip_gen: v7x
topology: tpu7x:2x2x1
jax: 0.10.0
libtpu: 0.0.40
codegen_flags: <defaults>
</compile_context>

<pallas_src>
import functools

import numpy as np
import jax
import jax.numpy as jnp
from jax import lax
from jax.experimental import pallas as pl
from jax.experimental.pallas import tpu as pltpu

# ---- model dims (match the nn.Module __init__) ----
DIM_CIDX = 8
DIM_SLOT = 8
NUM_CIDX = 10
NUM_SLOT = 6
D_MODEL = 8            # emb_floor output / transformer d_model
N_HEAD = 4
HEAD_DIM = D_MODEL // N_HEAD
D_FF = 16              # transformer dim_feedforward
N_LAYERS = 3
D_UNIT = 16            # emb_unit output
DIM_F2 = 4
DIM_F3 = 6
FF_IN = DIM_CIDX + DIM_SLOT + D_UNIT + DIM_F2 + DIM_F3   # = 42
FF_HID = 20
LN_EPS = 1e-5


def fused_kernel(B, U, L,
                 gf_ref, cs_ref, f2_ref, f3_ref, rmat_ref,
                 wfl_ref, bfl_ref,
                 wqkv_ref, bqkv_ref, wo_ref, bo_ref,
                 ln1w_ref, ln1b_ref, ln2w_ref, ln2b_ref,
                 l1w_ref, l1b_ref, l2w_ref, l2b_ref,
                 wu_ref, bu_ref,
                 w1cs_ref, w1g_ref, w1f2_ref, w1f3_ref, ffb1_ref,
                 w2_ref, ffb2_ref,
                 o_ref):
    """Whole forward in one kernel.

    gf_ref : [4, B*U*L]   floor features (column = (sample, unit, floor-row))
    cs_ref : [16, B]      [cidx_emb ; slot_emb] per sample
    f2_ref : [4, B], f3_ref : [6, N], rmat_ref : [B, N] one-hot repeat matrix
    o_ref  : [1, N]       ff_match scores (lane-dense output)
    """
    BU = B * U
    R = BU * L
    scale = 1.0 / float(np.sqrt(HEAD_DIM))

    def mm(a, b):
        return jnp.dot(a, b, preferred_element_type=jnp.float32)

    def layernorm(x, w, b):
        # feature axis is axis 0 in the transposed layout
        mu = jnp.mean(x, axis=0, keepdims=True)
        xc = x - mu
        var = jnp.mean(xc * xc, axis=0, keepdims=True)
        return xc * lax.rsqrt(var + LN_EPS) * w + b

    # ---- segment-sum matrices + block-diagonal attention bias, built from 2-D
    #      iota (no host-side kron constant, no extra input DMA) ----
    r_i = lax.broadcasted_iota(jnp.int32, (R, BU), 0)
    u_j = lax.broadcasted_iota(jnp.int32, (R, BU), 1)
    sum_l = ((r_i >= u_j * L) & (r_i < (u_j + 1) * L)).astype(jnp.float32)     # [R, BU]
    bu_i = lax.broadcasted_iota(jnp.int32, (BU, B), 0)
    b_j = lax.broadcasted_iota(jnp.int32, (BU, B), 1)
    sum_u = ((bu_i >= b_j * U) & (bu_i < (b_j + 1) * U)).astype(jnp.float32)   # [BU, B]
    same_unit = lax.dot_general(sum_l, sum_l, (((1,), (1,)), ((), ())),
                                preferred_element_type=jnp.float32)            # [R, R]
    attn_bias = (same_unit - 1.0) * 1e30   # 0 inside a unit, -1e30 across units

    # ---- emb_floor: [8, 4] @ [4, R] ----
    h = mm(wfl_ref[...], gf_ref[...]) + bfl_ref[...]                           # [8, R]

    # TODO(synk): all Dropout layers (attention, layer, ff_match) are identity (eval).
    for layer in range(N_LAYERS):   # 3 tiny layers; no vreg pressure -> plain unroll
        # fused QKV projection over all heads: [24, 8] @ [8, R]
        qkv = mm(wqkv_ref[layer], h) + bqkv_ref[layer]                         # [24, R]
        q = qkv[0:D_MODEL, :] * scale
        k = qkv[D_MODEL:2 * D_MODEL, :]
        v = qkv[2 * D_MODEL:3 * D_MODEL, :]
        q3 = q.reshape(N_HEAD, HEAD_DIM, R)
        k3 = k.reshape(N_HEAD, HEAD_DIM, R)
        v3 = v.reshape(N_HEAD, HEAD_DIM, R)
        # scores for all heads at once (batch dim = head); cross-unit pairs masked
        s = lax.dot_general(q3, k3, (((1,), (1,)), ((0,), (0,))),
                            preferred_element_type=jnp.float32)                # [H, R, R]
        s = s + attn_bias
        s = s - jnp.max(s, axis=-1, keepdims=True)
        e = jnp.exp(s)
        p = e * pl.reciprocal(jnp.sum(e, axis=-1, keepdims=True), approx=True)
        # o3[h, d, i] = sum_j v3[h, d, j] * p[h, i, j]
        o3 = lax.dot_general(v3, p, (((2,), (2,)), ((0,), (0,))),
                             preferred_element_type=jnp.float32)               # [H, HD, R]
        # single out-projection over concatenated heads: [8, 8] @ [8, R]
        attn = mm(wo_ref[layer], o3.reshape(D_MODEL, R)) + bo_ref[layer]
        h = layernorm(h + attn, ln1w_ref[layer], ln1b_ref[layer])
        # feed-forward: [16, 8] @ [8, R] -> ReLU -> [8, 16] @ [16, R]
        ff = jnp.maximum(mm(l1w_ref[layer], h) + l1b_ref[layer], 0.0)
        ff = mm(l2w_ref[layer], ff) + l2b_ref[layer]
        h = layernorm(h + ff, ln2w_ref[layer], ln2b_ref[layer])

    # ---- sum over floor rows per unit, emb_unit, sum over units per sample ----
    unit_vec = mm(h, sum_l)                                                    # [8, BU]
    unit_emb = jnp.maximum(mm(wu_ref[...], unit_vec) + bu_ref[...], 0.0)       # [16, BU]
    sample_emb = mm(unit_emb, sum_u)                                           # [16, B]

    # ---- ff_match fused: Linear(42,20) split by input blocks; repeat_interleave
    #      expressed as a [B, N] one-hot matmul; output is lane-dense [1, N] ----
    per_sample = (mm(w1cs_ref[...], cs_ref[...])
                  + mm(w1g_ref[...], sample_emb)
                  + mm(w1f2_ref[...], f2_ref[...]))                            # [20, B]
    h1 = mm(per_sample, rmat_ref[...]) + mm(w1f3_ref[...], f3_ref[...]) + ffb1_ref[...]
    h1 = jnp.maximum(h1, 0.0)                                                  # [20, N]
    o_ref[...] = mm(w2_ref[...], h1) + ffb2_ref[...]                           # [1, N]


_VMEM = functools.partial(pl.BlockSpec, memory_space=pltpu.MemorySpace.VMEM)


def fused_forward(gf_t, cs_t, f2_t, f3_t, rmat, p, *, B, U, L):
    N = f3_t.shape[1]
    args = (gf_t, cs_t, f2_t, f3_t, rmat,
            p['wfl'], p['bfl'],
            p['wqkv'], p['bqkv'], p['wo'], p['bo'],
            p['ln1w'], p['ln1b'], p['ln2w'], p['ln2b'],
            p['l1w'], p['l1b'], p['l2w'], p['l2b'],
            p['wu'], p['bu'],
            p['w1_cs'], p['w1_g'], p['w1_f2'], p['w1_f3'], p['ffb1'],
            p['w2'], p['ffb2'])
    # Single gridless call: everything fits in a fraction of one (8,128) tile, so a
    # grid / megacore split or 256-wide lane tiling would be pure overhead here.
    # TODO(synk): at production BU*L / N sizes, add a "parallel" grid over the lane
    # axis (256-wide tiles on v6e/v7x, 128 on v5e) sized against v7x's 64 MiB VMEM.
    return pl.pallas_call(
        functools.partial(fused_kernel, B, U, L),
        out_shape=jax.ShapeDtypeStruct((1, N), jnp.float32),
        in_specs=[_VMEM() for _ in args],
        out_specs=_VMEM(),
    )(*args)


def model_forward(p, cidxs, slots, gfeats, f2, f3, nf3_np):
    """gfeats: [B, U, L, 4]; f2: [B, 4]; f3: [sum(nf3), 6]; nf3_np: static int array [B]."""
    B, U, L, _ = gfeats.shape
    # embedding gathers + layout plumbing stay as XLA glue (tiny gathers/transposes)
    # TODO(synk): could be pulled in-kernel via scalar-prefetch indices if needed.
    cidx_e = jnp.take(p['emb_cidx'], cidxs, axis=0)             # [B, 8]
    slot_e = jnp.take(p['emb_slot'], slots, axis=0)             # [B, 8]
    cs_t = jnp.concatenate([cidx_e, slot_e], axis=1).T          # [16, B]
    gf_t = gfeats.reshape(B * U * L, 4).T                       # [4, B*U*L]
    f2_t = f2.T                                                 # [4, B]
    f3_t = f3.T                                                 # [6, N]
    rep_idx = np.repeat(np.arange(B), np.asarray(nf3_np))       # static repeat_interleave
    rmat = jnp.asarray((np.arange(B)[:, None] == rep_idx[None, :]).astype(np.float32))
    y = fused_forward(gf_t, cs_t, f2_t, f3_t, rmat, p, B=B, U=U, L=L)   # [1, N]
    return y.reshape(-1), jnp.asarray(nf3_np, jnp.int32)


def init_params(seed=0):
    keys = iter(jax.random.split(jax.random.PRNGKey(seed), 64))

    def nrm(shape, scale=0.3):
        return jax.random.normal(next(keys), shape, jnp.float32) * scale

    p = {}
    p['emb_cidx'] = nrm((NUM_CIDX, DIM_CIDX), 0.5)
    p['emb_slot'] = nrm((NUM_SLOT, DIM_SLOT), 0.5)
    # all Linear weights kept in native torch [out, in] layout, biases as [out, 1]
    p['wfl'] = nrm((D_MODEL, 4))
    p['bfl'] = nrm((D_MODEL, 1), 0.05)
    p['wqkv'] = nrm((N_LAYERS, 3 * D_MODEL, D_MODEL))     # fused in_proj [q;k;v]
    p['bqkv'] = nrm((N_LAYERS, 3 * D_MODEL, 1), 0.05)
    p['wo'] = nrm((N_LAYERS, D_MODEL, D_MODEL))
    p['bo'] = nrm((N_LAYERS, D_MODEL, 1), 0.05)
    p['ln1w'] = jnp.ones((N_LAYERS, D_MODEL, 1), jnp.float32)
    p['ln1b'] = jnp.zeros((N_LAYERS, D_MODEL, 1), jnp.float32)
    p['ln2w'] = jnp.ones((N_LAYERS, D_MODEL, 1), jnp.float32)
    p['ln2b'] = jnp.zeros((N_LAYERS, D_MODEL, 1), jnp.float32)
    p['l1w'] = nrm((N_LAYERS, D_FF, D_MODEL))
    p['l1b'] = nrm((N_LAYERS, D_FF, 1), 0.05)
    p['l2w'] = nrm((N_LAYERS, D_MODEL, D_FF))
    p['l2b'] = nrm((N_LAYERS, D_MODEL, 1), 0.05)
    p['wu'] = nrm((D_UNIT, D_MODEL))
    p['bu'] = nrm((D_UNIT, 1), 0.05)
    # ff_match Linear(42, 20) split by input-feature blocks [cidx+slot | gfeat | f2 | f3]
    w1 = nrm((FF_HID, FF_IN), 0.2)
    p['w1_cs'] = w1[:, 0:DIM_CIDX + DIM_SLOT]              # [20, 16]
    p['w1_g'] = w1[:, DIM_CIDX + DIM_SLOT:DIM_CIDX + DIM_SLOT + D_UNIT]   # [20, 16]
    p['w1_f2'] = w1[:, 32:36]                              # [20, 4]
    p['w1_f3'] = w1[:, 36:42]                              # [20, 6]
    p['ffb1'] = nrm((FF_HID, 1), 0.05)
    p['w2'] = nrm((1, FF_HID), 0.2)
    p['ffb2'] = nrm((1, 1), 0.05)
    return p


if __name__ == "__main__":
    B, U, L = 2, 2, 4                       # samples, units per sample, floor rows per unit
    nf3 = np.array([3, 2], dtype=np.int32)  # candidates per sample (static for this run)
    N = int(nf3.sum())

    params = init_params(0)
    k1, k2, k3, k4, k5 = jax.random.split(jax.random.PRNGKey(0), 5)
    cidxs = jax.random.randint(k1, (B,), 0, NUM_CIDX, dtype=jnp.int32)
    slots = jax.random.randint(k2, (B,), 0, NUM_SLOT, dtype=jnp.int32)
    gfeats = jax.random.normal(k3, (B, U, L, 4), jnp.float32)
    f2 = jax.random.normal(k4, (B, DIM_F2), jnp.float32)
    f3 = jax.random.normal(k5, (N, DIM_F3), jnp.float32)

    y, nf3_out = model_forward(params, cidxs, slots, gfeats, f2, f3, nf3)
    y = jax.block_until_ready(y)
    nf3_out = jax.block_until_ready(nf3_out)
    assert y.shape == (N,) and nf3_out.shape == (B,)
    assert bool(jnp.all(jnp.isfinite(y)))
    print("KERNEL_OK")
</pallas_src>

<mosaic_0001>
module attributes {stable_mosaic.version = 11 : i64} {
  func.func @fused_kernel(%arg0: memref<4x16xf32, #tpu.memory_space<vmem>>, %arg1: memref<16x2xf32, #tpu.memory_space<vmem>>, %arg2: memref<4x2xf32, #tpu.memory_space<vmem>>, %arg3: memref<6x5xf32, #tpu.memory_space<vmem>>, %arg4: memref<2x5xf32, #tpu.memory_space<vmem>>, %arg5: memref<8x4xf32, #tpu.memory_space<vmem>>, %arg6: memref<8x1xf32, #tpu.memory_space<vmem>>, %arg7: memref<3x24x8xf32, #tpu.memory_space<vmem>>, %arg8: memref<3x24x1xf32, #tpu.memory_space<vmem>>, %arg9: memref<3x8x8xf32, #tpu.memory_space<vmem>>, %arg10: memref<3x8x1xf32, #tpu.memory_space<vmem>>, %arg11: memref<3x8x1xf32, #tpu.memory_space<vmem>>, %arg12: memref<3x8x1xf32, #tpu.memory_space<vmem>>, %arg13: memref<3x8x1xf32, #tpu.memory_space<vmem>>, %arg14: memref<3x8x1xf32, #tpu.memory_space<vmem>>, %arg15: memref<3x16x8xf32, #tpu.memory_space<vmem>>, %arg16: memref<3x16x1xf32, #tpu.memory_space<vmem>>, %arg17: memref<3x8x16xf32, #tpu.memory_space<vmem>>, %arg18: memref<3x8x1xf32, #tpu.memory_space<vmem>>, %arg19: memref<16x8xf32, #tpu.memory_space<vmem>>, %arg20: memref<16x1xf32, #tpu.memory_space<vmem>>, %arg21: memref<20x16xf32, #tpu.memory_space<vmem>>, %arg22: memref<20x16xf32, #tpu.memory_space<vmem>>, %arg23: memref<20x4xf32, #tpu.memory_space<vmem>>, %arg24: memref<20x6xf32, #tpu.memory_space<vmem>>, %arg25: memref<20x1xf32, #tpu.memory_space<vmem>>, %arg26: memref<1x20xf32, #tpu.memory_space<vmem>>, %arg27: memref<1x1xf32, #tpu.memory_space<vmem>>, %arg28: memref<1x5xf32, #tpu.memory_space<vmem>>) attributes {dimension_semantics = [], scalar_prefetch = 0 : i64, scratch_operands = 0 : i64, tpu.core_type = #tpu.core_type<tc>} {
    %0 = tpu.iota {dimensions = array<i32: 0>} : vector<16x4xi32>
    %1 = tpu.iota {dimensions = array<i32: 1>} : vector<16x4xi32>
    %c4_i32 = arith.constant 4 : i32
    %2 = vector.broadcast %c4_i32 : i32 to vector<16x4xi32>
    %3 = arith.muli %1, %2 : vector<16x4xi32>
    %4 = arith.cmpi sge, %0, %3 : vector<16x4xi32>
    %c1_i32 = arith.constant 1 : i32
    %5 = vector.broadcast %c1_i32 : i32 to vector<16x4xi32>
    %6 = arith.addi %1, %5 : vector<16x4xi32>
    %c4_i32_0 = arith.constant 4 : i32
    %7 = vector.broadcast %c4_i32_0 : i32 to vector<16x4xi32>
    %8 = arith.muli %6, %7 : vector<16x4xi32>
    %9 = arith.cmpi slt, %0, %8 : vector<16x4xi32>
    %10 = arith.andi %4, %9 : vector<16x4xi1>
    %11 = arith.extui %10 : vector<16x4xi1> to vector<16x4xi32>
    %12 = arith.sitofp %11 : vector<16x4xi32> to vector<16x4xf32>
    %13 = tpu.iota {dimensions = array<i32: 0>} : vector<4x2xi32>
    %14 = tpu.iota {dimensions = array<i32: 1>} : vector<4x2xi32>
    %c2_i32 = arith.constant 2 : i32
    %15 = vector.broadcast %c2_i32 : i32 to vector<4x2xi32>
    %16 = arith.muli %14, %15 : vector<4x2xi32>
    %17 = arith.cmpi sge, %13, %16 : vector<4x2xi32>
    %c1_i32_1 = arith.constant 1 : i32
    %18 = vector.broadcast %c1_i32_1 : i32 to vector<4x2xi32>
    %19 = arith.addi %14, %18 : vector<4x2xi32>
    %c2_i32_2 = arith.constant 2 : i32
    %20 = vector.broadcast %c2_i32_2 : i32 to vector<4x2xi32>
    %21 = arith.muli %19, %20 : vector<4x2xi32>
    %22 = arith.cmpi slt, %13, %21 : vector<4x2xi32>
    %23 = arith.andi %17, %22 : vector<4x2xi1>
    %24 = arith.extui %23 : vector<4x2xi1> to vector<4x2xi32>
    %25 = arith.sitofp %24 : vector<4x2xi32> to vector<4x2xf32>
    %cst = arith.constant dense<0.000000e+00> : vector<16x16xf32>
    %26 = tpu.matmul %12, %12, %cst {dimension_numbers = #tpu.dot_dimension_numbers<[1], [1], [0], [0], [0, 0, 1, 0], [], []>} : vector<16x4xf32>, vector<16x4xf32>, vector<16x16xf32> -> vector<16x16xf32>
    %cst_3 = arith.constant 1.000000e+00 : f32
    %27 = vector.broadcast %cst_3 : f32 to vector<16x16xf32>
    %28 = arith.subf %26, %27 : vector<16x16xf32>
    %cst_4 = arith.constant 1.000000e+30 : f32
    %29 = vector.broadcast %cst_4 : f32 to vector<16x16xf32>
    %30 = arith.mulf %28, %29 : vector<16x16xf32>
    %c0 = arith.constant 0 : index
    %c0_5 = arith.constant 0 : index
    %31 = vector.load %arg5[%c0, %c0_5] : memref<8x4xf32, #tpu.memory_space<vmem>>, vector<8x4xf32>
    %c0_6 = arith.constant 0 : index
    %c0_7 = arith.constant 0 : index
    %32 = vector.load %arg0[%c0_6, %c0_7] : memref<4x16xf32, #tpu.memory_space<vmem>>, vector<4x16xf32>
    %cst_8 = arith.constant dense<0.000000e+00> : vector<8x16xf32>
    %33 = tpu.matmul %31, %32, %cst_8 {dimension_numbers = #tpu.dot_dimension_numbers<[1], [0], [0], [1], [0, 0, 1, 1], [], []>} : vector<8x4xf32>, vector<4x16xf32>, vector<8x16xf32> -> vector<8x16xf32>
    %c0_9 = arith.constant 0 : index
    %c0_10 = arith.constant 0 : index
    %34 = vector.load %arg6[%c0_9, %c0_10] : memref<8x1xf32, #tpu.memory_space<vmem>>, vector<8x1xf32>
    %35 = vector.broadcast %34 : vector<8x1xf32> to vector<8x16xf32>
    %36 = arith.addf %33, %35 : vector<8x16xf32>
    %c0_11 = arith.constant 0 : index
    %c0_12 = arith.constant 0 : index
    %c0_13 = arith.constant 0 : index
    %37 = vector.load %arg7[%c0_11, %c0_12, %c0_13] : memref<3x24x8xf32, #tpu.memory_space<vmem>>, vector<1x24x8xf32>
    %38 = vector.shape_cast %37 : vector<1x24x8xf32> to vector<24x8xf32>
    %cst_14 = arith.constant dense<0.000000e+00> : vector<24x16xf32>
    %39 = tpu.matmul %38, %36, %cst_14 {dimension_numbers = #tpu.dot_dimension_numbers<[1], [0], [0], [1], [0, 0, 1, 1], [], []>} : vector<24x8xf32>, vector<8x16xf32>, vector<24x16xf32> -> vector<24x16xf32>
    %c0_15 = arith.constant 0 : index
    %c0_16 = arith.constant 0 : index
    %c0_17 = arith.constant 0 : index
    %40 = vector.load %arg8[%c0_15, %c0_16, %c0_17] : memref<3x24x1xf32, #tpu.memory_space<vmem>>, vector<1x24x1xf32>
    %41 = vector.shape_cast %40 : vector<1x24x1xf32> to vector<24x1xf32>
    %42 = vector.broadcast %41 : vector<24x1xf32> to vector<24x16xf32>
    %43 = arith.addf %39, %42 : vector<24x16xf32>
    %44 = vector.extract_strided_slice %43 {offsets = [0, 0], sizes = [8, 16], strides = [1, 1]} : vector<24x16xf32> to vector<8x16xf32>
    %cst_18 = arith.constant 0.707106769 : f32
    %45 = vector.broadcast %cst_18 : f32 to vector<8x16xf32>
    %46 = arith.mulf %44, %45 : vector<8x16xf32>
    %47 = vector.extract_strided_slice %43 {offsets = [8, 0], sizes = [8, 16], strides = [1, 1]} : vector<24x16xf32> to vector<8x16xf32>
    %48 = vector.extract_strided_slice %43 {offsets = [16, 0], sizes = [8, 16], strides = [1, 1]} : vector<24x16xf32> to vector<8x16xf32>
    %49 = vector.shape_cast %46 : vector<8x16xf32> to vector<4x2x16xf32>
    %50 = vector.shape_cast %47 : vector<8x16xf32> to vector<4x2x16xf32>
    %51 = vector.shape_cast %48 : vector<8x16xf32> to vector<4x2x16xf32>
    %cst_19 = arith.constant dense<0.000000e+00> : vector<4x16x16xf32>
    %52 = tpu.matmul %49, %50, %cst_19 {dimension_numbers = #tpu.dot_dimension_numbers<[1], [1], [2], [2], [0, 0, 0, 2, 1, 2], [0], [0]>} : vector<4x2x16xf32>, vector<4x2x16xf32>, vector<4x16x16xf32> -> vector<4x16x16xf32>
    %53 = vector.shape_cast %30 : vector<16x16xf32> to vector<1x16x16xf32>
    %54 = vector.broadcast %53 : vector<1x16x16xf32> to vector<4x16x16xf32>
    %55 = arith.addf %52, %54 : vector<4x16x16xf32>
    %cst_20 = arith.constant dense<0xFF800000> : vector<4x16xf32>
    %56 = vector.multi_reduction <maximumf>, %55, %cst_20 [2] : vector<4x16x16xf32> to vector<4x16xf32>
    %57 = vector.shape_cast %56 : vector<4x16xf32> to vector<4x16x1xf32>
    %58 = vector.broadcast %57 : vector<4x16x1xf32> to vector<4x16x16xf32>
    %59 = arith.subf %55, %58 : vector<4x16x16xf32>
    %60 = math.exp %59 : vector<4x16x16xf32>
    %cst_21 = arith.constant dense<0.000000e+00> : vector<4x16xf32>
    %61 = vector.multi_reduction <add>, %60, %cst_21 [2] : vector<4x16x16xf32> to vector<4x16xf32>
    %62 = vector.shape_cast %61 : vector<4x16xf32> to vector<4x16x1xf32>
    %63 = tpu.reciprocal %62 {approx = true} : vector<4x16x1xf32> -> vector<4x16x1xf32>
    %64 = vector.broadcast %63 : vector<4x16x1xf32> to vector<4x16x16xf32>
    %65 = arith.mulf %60, %64 : vector<4x16x16xf32>
    %cst_22 = arith.constant dense<0.000000e+00> : vector<4x2x16xf32>
    %66 = tpu.matmul %51, %65, %cst_22 {dimension_numbers = #tpu.dot_dimension_numbers<[2], [2], [1], [1], [0, 0, 0, 1, 1, 1], [0], [0]>} : vector<4x2x16xf32>, vector<4x16x16xf32>, vector<4x2x16xf32> -> vector<4x2x16xf32>
    %c0_23 = arith.constant 0 : index
    %c0_24 = arith.constant 0 : index
    %c0_25 = arith.constant 0 : index
    %67 = vector.load %arg9[%c0_23, %c0_24, %c0_25] : memref<3x8x8xf32, #tpu.memory_space<vmem>>, vector<1x8x8xf32>
    %68 = vector.shape_cast %67 : vector<1x8x8xf32> to vector<8x8xf32>
    %69 = vector.shape_cast %66 : vector<4x2x16xf32> to vector<8x16xf32>
    %cst_26 = arith.constant dense<0.000000e+00> : vector<8x16xf32>
    %70 = tpu.matmul %68, %69, %cst_26 {dimension_numbers = #tpu.dot_dimension_numbers<[1], [0], [0], [1], [0, 0, 1, 1], [], []>} : vector<8x8xf32>, vector<8x16xf32>, vector<8x16xf32> -> vector<8x16xf32>
    %c0_27 = arith.constant 0 : index
    %c0_28 = arith.constant 0 : index
    %c0_29 = arith.constant 0 : index
    %71 = vector.load %arg10[%c0_27, %c0_28, %c0_29] : memref<3x8x1xf32, #tpu.memory_space<vmem>>, vector<1x8x1xf32>
    %72 = vector.shape_cast %71 : vector<1x8x1xf32> to vector<8x1xf32>
    %73 = vector.broadcast %72 : vector<8x1xf32> to vector<8x16xf32>
    %74 = arith.addf %70, %73 : vector<8x16xf32>
    %75 = arith.addf %36, %74 : vector<8x16xf32>
    %c0_30 = arith.constant 0 : index
    %c0_31 = arith.constant 0 : index
    %c0_32 = arith.constant 0 : index
    %76 = vector.load %arg11[%c0_30, %c0_31, %c0_32] : memref<3x8x1xf32, #tpu.memory_space<vmem>>, vector<1x8x1xf32>
    %77 = vector.shape_cast %76 : vector<1x8x1xf32> to vector<8x1xf32>
    %c0_33 = arith.constant 0 : index
    %c0_34 = arith.constant 0 : index
    %c0_35 = arith.constant 0 : index
    %78 = vector.load %arg12[%c0_33, %c0_34, %c0_35] : memref<3x8x1xf32, #tpu.memory_space<vmem>>, vector<1x8x1xf32>
    %79 = vector.shape_cast %78 : vector<1x8x1xf32> to vector<8x1xf32>
    %cst_36 = arith.constant dense<0.000000e+00> : vector<16xf32>
    %80 = vector.multi_reduction <add>, %75, %cst_36 [0] : vector<8x16xf32> to vector<16xf32>
    %81 = vector.shape_cast %80 : vector<16xf32> to vector<1x16xf32>
    %cst_37 = arith.constant 8.000000e+00 : f32
    %82 = vector.broadcast %cst_37 : f32 to vector<1x16xf32>
    %83 = arith.divf %81, %82 : vector<1x16xf32>
    %84 = vector.broadcast %83 : vector<1x16xf32> to vector<8x16xf32>
    %85 = arith.subf %75, %84 : vector<8x16xf32>
    %86 = arith.mulf %85, %85 : vector<8x16xf32>
    %cst_38 = arith.constant dense<0.000000e+00> : vector<16xf32>
    %87 = vector.multi_reduction <add>, %86, %cst_38 [0] : vector<8x16xf32> to vector<16xf32>
    %88 = vector.shape_cast %87 : vector<16xf32> to vector<1x16xf32>
    %cst_39 = arith.constant 8.000000e+00 : f32
    %89 = vector.broadcast %cst_39 : f32 to vector<1x16xf32>
    %90 = arith.divf %88, %89 : vector<1x16xf32>
    %cst_40 = arith.constant 9.99999974E-6 : f32
    %91 = vector.broadcast %cst_40 : f32 to vector<1x16xf32>
    %92 = arith.addf %90, %91 : vector<1x16xf32>
    %93 = math.rsqrt %92 : vector<1x16xf32>
    %94 = vector.broadcast %93 : vector<1x16xf32> to vector<8x16xf32>
    %95 = arith.mulf %85, %94 : vector<8x16xf32>
    %96 = vector.broadcast %77 : vector<8x1xf32> to vector<8x16xf32>
    %97 = arith.mulf %95, %96 : vector<8x16xf32>
    %98 = vector.broadcast %79 : vector<8x1xf32> to vector<8x16xf32>
    %99 = arith.addf %97, %98 : vector<8x16xf32>
    %c0_41 = arith.constant 0 : index
    %c0_42 = arith.constant 0 : index
    %c0_43 = arith.constant 0 : index
    %100 = vector.load %arg15[%c0_41, %c0_42, %c0_43] : memref<3x16x8xf32, #tpu.memory_space<vmem>>, vector<1x16x8xf32>
    %101 = vector.shape_cast %100 : vector<1x16x8xf32> to vector<16x8xf32>
    %cst_44 = arith.constant dense<0.000000e+00> : vector<16x16xf32>
    %102 = tpu.matmul %101, %99, %cst_44 {dimension_numbers = #tpu.dot_dimension_numbers<[1], [0], [0], [1], [0, 0, 1, 1], [], []>} : vector<16x8xf32>, vector<8x16xf32>, vector<16x16xf32> -> vector<16x16xf32>
    %c0_45 = arith.constant 0 : index
    %c0_46 = arith.constant 0 : index
    %c0_47 = arith.constant 0 : index
    %103 = vector.load %arg16[%c0_45, %c0_46, %c0_47] : memref<3x16x1xf32, #tpu.memory_space<vmem>>, vector<1x16x1xf32>
    %104 = vector.shape_cast %103 : vector<1x16x1xf32> to vector<16x1xf32>
    %105 = vector.broadcast %104 : vector<16x1xf32> to vector<16x16xf32>
    %106 = arith.addf %102, %105 : vector<16x16xf32>
    %cst_48 = arith.constant 0.000000e+00 : f32
    %107 = vector.broadcast %cst_48 : f32 to vector<16x16xf32>
    %108 = arith.maximumf %106, %107 : vector<16x16xf32>
    %c0_49 = arith.constant 0 : index
    %c0_50 = arith.constant 0 : index
    %c0_51 = arith.constant 0 : index
    %109 = vector.load %arg17[%c0_49, %c0_50, %c0_51] : memref<3x8x16xf32, #tpu.memory_space<vmem>>, vector<1x8x16xf32>
    %110 = vector.shape_cast %109 : vector<1x8x16xf32> to vector<8x16xf32>
    %cst_52 = arith.constant dense<0.000000e+00> : vector<8x16xf32>
    %111 = tpu.matmul %110, %108, %cst_52 {dimension_numbers = #tpu.dot_dimension_numbers<[1], [0], [0], [1], [0, 0, 1, 1], [], []>} : vector<8x16xf32>, vector<16x16xf32>, vector<8x16xf32> -> vector<8x16xf32>
    %c0_53 = arith.constant 0 : index
    %c0_54 = arith.constant 0 : index
    %c0_55 = arith.constant 0 : index
    %112 = vector.load %arg18[%c0_53, %c0_54, %c0_55] : memref<3x8x1xf32, #tpu.memory_space<vmem>>, vector<1x8x1xf32>
    %113 = vector.shape_cast %112 : vector<1x8x1xf32> to vector<8x1xf32>
    %114 = vector.broadcast %113 : vector<8x1xf32> to vector<8x16xf32>
    %115 = arith.addf %111, %114 : vector<8x16xf32>
    %116 = arith.addf %99, %115 : vector<8x16xf32>
    %c0_56 = arith.constant 0 : index
    %c0_57 = arith.constant 0 : index
    %c0_58 = arith.constant 0 : index
    %117 = vector.load %arg13[%c0_56, %c0_57, %c0_58] : memref<3x8x1xf32, #tpu.memory_space<vmem>>, vector<1x8x1xf32>
    %118 = vector.shape_cast %117 : vector<1x8x1xf32> to vector<8x1xf32>
    %c0_59 = arith.constant 0 : index
    %c0_60 = arith.constant 0 : index
    %c0_61 = arith.constant 0 : index
    %119 = vector.load %arg14[%c0_59, %c0_60, %c0_61] : memref<3x8x1xf32, #tpu.memory_space<vmem>>, vector<1x8x1xf32>
    %120 = vector.shape_cast %119 : vector<1x8x1xf32> to vector<8x1xf32>
    %cst_62 = arith.constant dense<0.000000e+00> : vector<16xf32>
    %121 = vector.multi_reduction <add>, %116, %cst_62 [0] : vector<8x16xf32> to vector<16xf32>
    %122 = vector.shape_cast %121 : vector<16xf32> to vector<1x16xf32>
    %cst_63 = arith.constant 8.000000e+00 : f32
    %123 = vector.broadcast %cst_63 : f32 to vector<1x16xf32>
    %124 = arith.divf %122, %123 : vector<1x16xf32>
    %125 = vector.broadcast %124 : vector<1x16xf32> to vector<8x16xf32>
    %126 = arith.subf %116, %125 : vector<8x16xf32>
    %127 = arith.mulf %126, %126 : vector<8x16xf32>
    %cst_64 = arith.constant dense<0.000000e+00> : vector<16xf32>
    %128 = vector.multi_reduction <add>, %127, %cst_64 [0] : vector<8x16xf32> to vector<16xf32>
    %129 = vector.shape_cast %128 : vector<16xf32> to vector<1x16xf32>
    %cst_65 = arith.constant 8.000000e+00 : f32
    %130 = vector.broadcast %cst_65 : f32 to vector<1x16xf32>
    %131 = arith.divf %129, %130 : vector<1x16xf32>
    %cst_66 = arith.constant 9.99999974E-6 : f32
    %132 = vector.broadcast %cst_66 : f32 to vector<1x16xf32>
    %133 = arith.addf %131, %132 : vector<1x16xf32>
    %134 = math.rsqrt %133 : vector<1x16xf32>
    %135 = vector.broadcast %134 : vector<1x16xf32> to vector<8x16xf32>
    %136 = arith.mulf %126, %135 : vector<8x16xf32>
    %137 = vector.broadcast %118 : vector<8x1xf32> to vector<8x16xf32>
    %138 = arith.mulf %136, %137 : vector<8x16xf32>
    %139 = vector.broadcast %120 : vector<8x1xf32> to vector<8x16xf32>
    %140 = arith.addf %138, %139 : vector<8x16xf32>
    %c1 = arith.constant 1 : index
    %c0_67 = arith.constant 0 : index
    %c0_68 = arith.constant 0 : index
    %141 = vector.load %arg7[%c1, %c0_67, %c0_68] : memref<3x24x8xf32, #tpu.memory_space<vmem>>, vector<1x24x8xf32>
    %142 = vector.shape_cast %141 : vector<1x24x8xf32> to vector<24x8xf32>
    %cst_69 = arith.constant dense<0.000000e+00> : vector<24x16xf32>
    %143 = tpu.matmul %142, %140, %cst_69 {dimension_numbers = #tpu.dot_dimension_numbers<[1], [0], [0], [1], [0, 0, 1, 1], [], []>} : vector<24x8xf32>, vector<8x16xf32>, vector<24x16xf32> -> vector<24x16xf32>
    %c1_70 = arith.constant 1 : index
    %c0_71 = arith.constant 0 : index
    %c0_72 = arith.constant 0 : index
    %144 = vector.load %arg8[%c1_70, %c0_71, %c0_72] : memref<3x24x1xf32, #tpu.memory_space<vmem>>, vector<1x24x1xf32>
    %145 = vector.shape_cast %144 : vector<1x24x1xf32> to vector<24x1xf32>
    %146 = vector.broadcast %145 : vector<24x1xf32> to vector<24x16xf32>
    %147 = arith.addf %143, %146 : vector<24x16xf32>
    %148 = vector.extract_strided_slice %147 {offsets = [0, 0], sizes = [8, 16], strides = [1, 1]} : vector<24x16xf32> to vector<8x16xf32>
    %cst_73 = arith.constant 0.707106769 : f32
    %149 = vector.broadcast %cst_73 : f32 to vector<8x16xf32>
    %150 = arith.mulf %148, %149 : vector<8x16xf32>
    %151 = vector.extract_strided_slice %147 {offsets = [8, 0], sizes = [8, 16], strides = [1, 1]} : vector<24x16xf32> to vector<8x16xf32>
    %152 = vector.extract_strided_slice %147 {offsets = [16, 0], sizes = [8, 16], strides = [1, 1]} : vector<24x16xf32> to vector<8x16xf32>
    %153 = vector.shape_cast %150 : vector<8x16xf32> to vector<4x2x16xf32>
    %154 = vector.shape_cast %151 : vector<8x16xf32> to vector<4x2x16xf32>
    %155 = vector.shape_cast %152 : vector<8x16xf32> to vector<4x2x16xf32>
    %cst_74 = arith.constant dense<0.000000e+00> : vector<4x16x16xf32>
    %156 = tpu.matmul %153, %154, %cst_74 {dimension_numbers = #tpu.dot_dimension_numbers<[1], [1], [2], [2], [0, 0, 0, 2, 1, 2], [0], [0]>} : vector<4x2x16xf32>, vector<4x2x16xf32>, vector<4x16x16xf32> -> vector<4x16x16xf32>
    %157 = vector.shape_cast %30 : vector<16x16xf32> to vector<1x16x16xf32>
    %158 = vector.broadcast %157 : vector<1x16x16xf32> to vector<4x16x16xf32>
    %159 = arith.addf %156, %158 : vector<4x16x16xf32>
    %cst_75 = arith.constant dense<0xFF800000> : vector<4x16xf32>
    %160 = vector.multi_reduction <maximumf>, %159, %cst_75 [2] : vector<4x16x16xf32> to vector<4x16xf32>
    %161 = vector.shape_cast %160 : vector<4x16xf32> to vector<4x16x1xf32>
    %162 = vector.broadcast %161 : vector<4x16x1xf32> to vector<4x16x16xf32>
    %163 = arith.subf %159, %162 : vector<4x16x16xf32>
    %164 = math.exp %163 : vector<4x16x16xf32>
    %cst_76 = arith.constant dense<0.000000e+00> : vector<4x16xf32>
    %165 = vector.multi_reduction <add>, %164, %cst_76 [2] : vector<4x16x16xf32> to vector<4x16xf32>
    %166 = vector.shape_cast %165 : vector<4x16xf32> to vector<4x16x1xf32>
    %167 = tpu.reciprocal %166 {approx = true} : vector<4x16x1xf32> -> vector<4x16x1xf32>
    %168 = vector.broadcast %167 : vector<4x16x1xf32> to vector<4x16x16xf32>
    %169 = arith.mulf %164, %168 : vector<4x16x16xf32>
    %cst_77 = arith.constant dense<0.000000e+00> : vector<4x2x16xf32>
    %170 = tpu.matmul %155, %169, %cst_77 {dimension_numbers = #tpu.dot_dimension_numbers<[2], [2], [1], [1], [0, 0, 0, 1, 1, 1], [0], [0]>} : vector<4x2x16xf32>, vector<4x16x16xf32>, vector<4x2x16xf32> -> vector<4x2x16xf32>
    %c1_78 = arith.constant 1 : index
    %c0_79 = arith.constant 0 : index
    %c0_80 = arith.constant 0 : index
    %171 = vector.load %arg9[%c1_78, %c0_79, %c0_80] : memref<3x8x8xf32, #tpu.memory_space<vmem>>, vector<1x8x8xf32>
    %172 = vector.shape_cast %171 : vector<1x8x8xf32> to vector<8x8xf32>
    %173 = vector.shape_cast %170 : vector<4x2x16xf32> to vector<8x16xf32>
    %cst_81 = arith.constant dense<0.000000e+00> : vector<8x16xf32>
    %174 = tpu.matmul %172, %173, %cst_81 {dimension_numbers = #tpu.dot_dimension_numbers<[1], [0], [0], [1], [0, 0, 1, 1], [], []>} : vector<8x8xf32>, vector<8x16xf32>, vector<8x16xf32> -> vector<8x16xf32>
    %c1_82 = arith.constant 1 : index
    %c0_83 = arith.constant 0 : index
    %c0_84 = arith.constant 0 : index
    %175 = vector.load %arg10[%c1_82, %c0_83, %c0_84] : memref<3x8x1xf32, #tpu.memory_space<vmem>>, vector<1x8x1xf32>
    %176 = vector.shape_cast %175 : vector<1x8x1xf32> to vector<8x1xf32>
    %177 = vector.broadcast %176 : vector<8x1xf32> to vector<8x16xf32>
    %178 = arith.addf %174, %177 : vector<8x16xf32>
    %179 = arith.addf %140, %178 : vector<8x16xf32>
    %c1_85 = arith.constant 1 : index
    %c0_86 = arith.constant 0 : index
    %c0_87 = arith.constant 0 : index
    %180 = vector.load %arg11[%c1_85, %c0_86, %c0_87] : memref<3x8x1xf32, #tpu.memory_space<vmem>>, vector<1x8x1xf32>
    %181 = vector.shape_cast %180 : vector<1x8x1xf32> to vector<8x1xf32>
    %c1_88 = arith.constant 1 : index
    %c0_89 = arith.constant 0 : index
    %c0_90 = arith.constant 0 : index
    %182 = vector.load %arg12[%c1_88, %c0_89, %c0_90] : memref<3x8x1xf32, #tpu.memory_space<vmem>>, vector<1x8x1xf32>
    %183 = vector.shape_cast %182 : vector<1x8x1xf32> to vector<8x1xf32>
    %cst_91 = arith.constant dense<0.000000e+00> : vector<16xf32>
    %184 = vector.multi_reduction <add>, %179, %cst_91 [0] : vector<8x16xf32> to vector<16xf32>
    %185 = vector.shape_cast %184 : vector<16xf32> to vector<1x16xf32>
    %cst_92 = arith.constant 8.000000e+00 : f32
    %186 = vector.broadcast %cst_92 : f32 to vector<1x16xf32>
    %187 = arith.divf %185, %186 : vector<1x16xf32>
    %188 = vector.broadcast %187 : vector<1x16xf32> to vector<8x16xf32>
    %189 = arith.subf %179, %188 : vector<8x16xf32>
    %190 = arith.mulf %189, %189 : vector<8x16xf32>
    %cst_93 = arith.constant dense<0.000000e+00> : vector<16xf32>
    %191 = vector.multi_reduction <add>, %190, %cst_93 [0] : vector<8x16xf32> to vector<16xf32>
    %192 = vector.shape_cast %191 : vector<16xf32> to vector<1x16xf32>
    %cst_94 = arith.constant 8.000000e+00 : f32
    %193 = vector.broadcast %cst_94 : f32 to vector<1x16xf32>
    %194 = arith.divf %192, %193 : vector<1x16xf32>
    %cst_95 = arith.constant 9.99999974E-6 : f32
    %195 = vector.broadcast %cst_95 : f32 to vector<1x16xf32>
    %196 = arith.addf %194, %195 : vector<1x16xf32>
    %197 = math.rsqrt %196 : vector<1x16xf32>
    %198 = vector.broadcast %197 : vector<1x16xf32> to vector<8x16xf32>
    %199 = arith.mulf %189, %198 : vector<8x16xf32>
    %200 = vector.broadcast %181 : vector<8x1xf32> to vector<8x16xf32>
    %201 = arith.mulf %199, %200 : vector<8x16xf32>
    %202 = vector.broadcast %183 : vector<8x1xf32> to vector<8x16xf32>
    %203 = arith.addf %201, %202 : vector<8x16xf32>
    %c1_96 = arith.constant 1 : index
    %c0_97 = arith.constant 0 : index
    %c0_98 = arith.constant 0 : index
    %204 = vector.load %arg15[%c1_96, %c0_97, %c0_98] : memref<3x16x8xf32, #tpu.memory_space<vmem>>, vector<1x16x8xf32>
    %205 = vector.shape_cast %204 : vector<1x16x8xf32> to vector<16x8xf32>
    %cst_99 = arith.constant dense<0.000000e+00> : vector<16x16xf32>
    %206 = tpu.matmul %205, %203, %cst_99 {dimension_numbers = #tpu.dot_dimension_numbers<[1], [0], [0], [1], [0, 0, 1, 1], [], []>} : vector<16x8xf32>, vector<8x16xf32>, vector<16x16xf32> -> vector<16x16xf32>
    %c1_100 = arith.constant 1 : index
    %c0_101 = arith.constant 0 : index
    %c0_102 = arith.constant 0 : index
    %207 = vector.load %arg16[%c1_100, %c0_101, %c0_102] : memref<3x16x1xf32, #tpu.memory_space<vmem>>, vector<1x16x1xf32>
    %208 = vector.shape_cast %207 : vector<1x16x1xf32> to vector<16x1xf32>
    %209 = vector.broadcast %208 : vector<16x1xf32> to vector<16x16xf32>
    %210 = arith.addf %206, %209 : vector<16x16xf32>
    %cst_103 = arith.constant 0.000000e+00 : f32
    %211 = vector.broadcast %cst_103 : f32 to vector<16x16xf32>
    %212 = arith.maximumf %210, %211 : vector<16x16xf32>
    %c1_104 = arith.constant 1 : index
    %c0_105 = arith.constant 0 : index
    %c0_106 = arith.constant 0 : index
    %213 = vector.load %arg17[%c1_104, %c0_105, %c0_106] : memref<3x8x16xf32, #tpu.memory_space<vmem>>, vector<1x8x16xf32>
    %214 = vector.shape_cast %213 : vector<1x8x16xf32> to vector<8x16xf32>
    %cst_107 = arith.constant dense<0.000000e+00> : vector<8x16xf32>
    %215 = tpu.matmul %214, %212, %cst_107 {dimension_numbers = #tpu.dot_dimension_numbers<[1], [0], [0], [1], [0, 0, 1, 1], [], []>} : vector<8x16xf32>, vector<16x16xf32>, vector<8x16xf32> -> vector<8x16xf32>
    %c1_108 = arith.constant 1 : index
    %c0_109 = arith.constant 0 : index
    %c0_110 = arith.constant 0 : index
    %216 = vector.load %arg18[%c1_108, %c0_109, %c0_110] : memref<3x8x1xf32, #tpu.memory_space<vmem>>, vector<1x8x1xf32>
    %217 = vector.shape_cast %216 : vector<1x8x1xf32> to vector<8x1xf32>
    %218 = vector.broadcast %217 : vector<8x1xf32> to vector<8x16xf32>
    %219 = arith.addf %215, %218 : vector<8x16xf32>
    %220 = arith.addf %203, %219 : vector<8x16xf32>
    %c1_111 = arith.constant 1 : index
    %c0_112 = arith.constant 0 : index
    %c0_113 = arith.constant 0 : index
    %221 = vector.load %arg13[%c1_111, %c0_112, %c0_113] : memref<3x8x1xf32, #tpu.memory_space<vmem>>, vector<1x8x1xf32>
    %222 = vector.shape_cast %221 : vector<1x8x1xf32> to vector<8x1xf32>
    %c1_114 = arith.constant 1 : index
    %c0_115 = arith.constant 0 : index
    %c0_116 = arith.constant 0 : index
    %223 = vector.load %arg14[%c1_114, %c0_115, %c0_116] : memref<3x8x1xf32, #tpu.memory_space<vmem>>, vector<1x8x1xf32>
    %224 = vector.shape_cast %223 : vector<1x8x1xf32> to vector<8x1xf32>
    %cst_117 = arith.constant dense<0.000000e+00> : vector<16xf32>
    %225 = vector.multi_reduction <add>, %220, %cst_117 [0] : vector<8x16xf32> to vector<16xf32>
    %226 = vector.shape_cast %225 : vector<16xf32> to vector<1x16xf32>
    %cst_118 = arith.constant 8.000000e+00 : f32
    %227 = vector.broadcast %cst_118 : f32 to vector<1x16xf32>
    %228 = arith.divf %226, %227 : vector<1x16xf32>
    %229 = vector.broadcast %228 : vector<1x16xf32> to vector<8x16xf32>
    %230 = arith.subf %220, %229 : vector<8x16xf32>
    %231 = arith.mulf %230, %230 : vector<8x16xf32>
    %cst_119 = arith.constant dense<0.000000e+00> : vector<16xf32>
    %232 = vector.multi_reduction <add>, %231, %cst_119 [0] : vector<8x16xf32> to vector<16xf32>
    %233 = vector.shape_cast %232 : vector<16xf32> to vector<1x16xf32>
    %cst_120 = arith.constant 8.000000e+00 : f32
    %234 = vector.broadcast %cst_120 : f32 to vector<1x16xf32>
    %235 = arith.divf %233, %234 : vector<1x16xf32>
    %cst_121 = arith.constant 9.99999974E-6 : f32
    %236 = vector.broadcast %cst_121 : f32 to vector<1x16xf32>
    %237 = arith.addf %235, %236 : vector<1x16xf32>
    %238 = math.rsqrt %237 : vector<1x16xf32>
    %239 = vector.broadcast %238 : vector<1x16xf32> to vector<8x16xf32>
    %240 = arith.mulf %230, %239 : vector<8x16xf32>
    %241 = vector.broadcast %222 : vector<8x1xf32> to vector<8x16xf32>
    %242 = arith.mulf %240, %241 : vector<8x16xf32>
    %243 = vector.broadcast %224 : vector<8x1xf32> to vector<8x16xf32>
    %244 = arith.addf %242, %243 : vector<8x16xf32>
    %c2 = arith.constant 2 : index
    %c0_122 = arith.constant 0 : index
    %c0_123 = arith.constant 0 : index
    %245 = vector.load %arg7[%c2, %c0_122, %c0_123] : memref<3x24x8xf32, #tpu.memory_space<vmem>>, vector<1x24x8xf32>
    %246 = vector.shape_cast %245 : vector<1x24x8xf32> to vector<24x8xf32>
    %cst_124 = arith.constant dense<0.000000e+00> : vector<24x16xf32>
    %247 = tpu.matmul %246, %244, %cst_124 {dimension_numbers = #tpu.dot_dimension_numbers<[1], [0], [0], [1], [0, 0, 1, 1], [], []>} : vector<24x8xf32>, vector<8x16xf32>, vector<24x16xf32> -> vector<24x16xf32>
    %c2_125 = arith.constant 2 : index
    %c0_126 = arith.constant 0 : index
    %c0_127 = arith.constant 0 : index
    %248 = vector.load %arg8[%c2_125, %c0_126, %c0_127] : memref<3x24x1xf32, #tpu.memory_space<vmem>>, vector<1x24x1xf32>
    %249 = vector.shape_cast %248 : vector<1x24x1xf32> to vector<24x1xf32>
    %250 = vector.broadcast %249 : vector<24x1xf32> to vector<24x16xf32>
    %251 = arith.addf %247, %250 : vector<24x16xf32>
    %252 = vector.extract_strided_slice %251 {offsets = [0, 0], sizes = [8, 16], strides = [1, 1]} : vector<24x16xf32> to vector<8x16xf32>
    %cst_128 = arith.constant 0.707106769 : f32
    %253 = vector.broadcast %cst_128 : f32 to vector<8x16xf32>
    %254 = arith.mulf %252, %253 : vector<8x16xf32>
    %255 = vector.extract_strided_slice %251 {offsets = [8, 0], sizes = [8, 16], strides = [1, 1]} : vector<24x16xf32> to vector<8x16xf32>
    %256 = vector.extract_strided_slice %251 {offsets = [16, 0], sizes = [8, 16], strides = [1, 1]} : vector<24x16xf32> to vector<8x16xf32>
    %257 = vector.shape_cast %254 : vector<8x16xf32> to vector<4x2x16xf32>
    %258 = vector.shape_cast %255 : vector<8x16xf32> to vector<4x2x16xf32>
    %259 = vector.shape_cast %256 : vector<8x16xf32> to vector<4x2x16xf32>
    %cst_129 = arith.constant dense<0.000000e+00> : vector<4x16x16xf32>
    %260 = tpu.matmul %257, %258, %cst_129 {dimension_numbers = #tpu.dot_dimension_numbers<[1], [1], [2], [2], [0, 0, 0, 2, 1, 2], [0], [0]>} : vector<4x2x16xf32>, vector<4x2x16xf32>, vector<4x16x16xf32> -> vector<4x16x16xf32>
    %261 = vector.shape_cast %30 : vector<16x16xf32> to vector<1x16x16xf32>
    %262 = vector.broadcast %261 : vector<1x16x16xf32> to vector<4x16x16xf32>
    %263 = arith.addf %260, %262 : vector<4x16x16xf32>
    %cst_130 = arith.constant dense<0xFF800000> : vector<4x16xf32>
    %264 = vector.multi_reduction <maximumf>, %263, %cst_130 [2] : vector<4x16x16xf32> to vector<4x16xf32>
    %265 = vector.shape_cast %264 : vector<4x16xf32> to vector<4x16x1xf32>
    %266 = vector.broadcast %265 : vector<4x16x1xf32> to vector<4x16x16xf32>
    %267 = arith.subf %263, %266 : vector<4x16x16xf32>
    %268 = math.exp %267 : vector<4x16x16xf32>
    %cst_131 = arith.constant dense<0.000000e+00> : vector<4x16xf32>
    %269 = vector.multi_reduction <add>, %268, %cst_131 [2] : vector<4x16x16xf32> to vector<4x16xf32>
    %270 = vector.shape_cast %269 : vector<4x16xf32> to vector<4x16x1xf32>
    %271 = tpu.reciprocal %270 {approx = true} : vector<4x16x1xf32> -> vector<4x16x1xf32>
    %272 = vector.broadcast %271 : vector<4x16x1xf32> to vector<4x16x16xf32>
    %273 = arith.mulf %268, %272 : vector<4x16x16xf32>
    %cst_132 = arith.constant dense<0.000000e+00> : vector<4x2x16xf32>
    %274 = tpu.matmul %259, %273, %cst_132 {dimension_numbers = #tpu.dot_dimension_numbers<[2], [2], [1], [1], [0, 0, 0, 1, 1, 1], [0], [0]>} : vector<4x2x16xf32>, vector<4x16x16xf32>, vector<4x2x16xf32> -> vector<4x2x16xf32>
    %c2_133 = arith.constant 2 : index
    %c0_134 = arith.constant 0 : index
    %c0_135 = arith.constant 0 : index
    %275 = vector.load %arg9[%c2_133, %c0_134, %c0_135] : memref<3x8x8xf32, #tpu.memory_space<vmem>>, vector<1x8x8xf32>
    %276 = vector.shape_cast %275 : vector<1x8x8xf32> to vector<8x8xf32>
    %277 = vector.shape_cast %274 : vector<4x2x16xf32> to vector<8x16xf32>
    %cst_136 = arith.constant dense<0.000000e+00> : vector<8x16xf32>
    %278 = tpu.matmul %276, %277, %cst_136 {dimension_numbers = #tpu.dot_dimension_numbers<[1], [0], [0], [1], [0, 0, 1, 1], [], []>} : vector<8x8xf32>, vector<8x16xf32>, vector<8x16xf32> -> vector<8x16xf32>
    %c2_137 = arith.constant 2 : index
    %c0_138 = arith.constant 0 : index
    %c0_139 = arith.constant 0 : index
    %279 = vector.load %arg10[%c2_137, %c0_138, %c0_139] : memref<3x8x1xf32, #tpu.memory_space<vmem>>, vector<1x8x1xf32>
    %280 = vector.shape_cast %279 : vector<1x8x1xf32> to vector<8x1xf32>
    %281 = vector.broadcast %280 : vector<8x1xf32> to vector<8x16xf32>
    %282 = arith.addf %278, %281 : vector<8x16xf32>
    %283 = arith.addf %244, %282 : vector<8x16xf32>
    %c2_140 = arith.constant 2 : index
    %c0_141 = arith.constant 0 : index
    %c0_142 = arith.constant 0 : index
    %284 = vector.load %arg11[%c2_140, %c0_141, %c0_142] : memref<3x8x1xf32, #tpu.memory_space<vmem>>, vector<1x8x1xf32>
    %285 = vector.shape_cast %284 : vector<1x8x1xf32> to vector<8x1xf32>
    %c2_143 = arith.constant 2 : index
    %c0_144 = arith.constant 0 : index
    %c0_145 = arith.constant 0 : index
    %286 = vector.load %arg12[%c2_143, %c0_144, %c0_145] : memref<3x8x1xf32, #tpu.memory_space<vmem>>, vector<1x8x1xf32>
    %287 = vector.shape_cast %286 : vector<1x8x1xf32> to vector<8x1xf32>
    %cst_146 = arith.constant dense<0.000000e+00> : vector<16xf32>
    %288 = vector.multi_reduction <add>, %283, %cst_146 [0] : vector<8x16xf32> to vector<16xf32>
    %289 = vector.shape_cast %288 : vector<16xf32> to vector<1x16xf32>
    %cst_147 = arith.constant 8.000000e+00 : f32
    %290 = vector.broadcast %cst_147 : f32 to vector<1x16xf32>
    %291 = arith.divf %289, %290 : vector<1x16xf32>
    %292 = vector.broadcast %291 : vector<1x16xf32> to vector<8x16xf32>
    %293 = arith.subf %283, %292 : vector<8x16xf32>
    %294 = arith.mulf %293, %293 : vector<8x16xf32>
    %cst_148 = arith.constant dense<0.000000e+00> : vector<16xf32>
    %295 = vector.multi_reduction <add>, %294, %cst_148 [0] : vector<8x16xf32> to vector<16xf32>
    %296 = vector.shape_cast %295 : vector<16xf32> to vector<1x16xf32>
    %cst_149 = arith.constant 8.000000e+00 : f32
    %297 = vector.broadcast %cst_149 : f32 to vector<1x16xf32>
    %298 = arith.divf %296, %297 : vector<1x16xf32>
    %cst_150 = arith.constant 9.99999974E-6 : f32
    %299 = vector.broadcast %cst_150 : f32 to vector<1x16xf32>
    %300 = arith.addf %298, %299 : vector<1x16xf32>
    %301 = math.rsqrt %300 : vector<1x16xf32>
    %302 = vector.broadcast %301 : vector<1x16xf32> to vector<8x16xf32>
    %303 = arith.mulf %293, %302 : vector<8x16xf32>
    %304 = vector.broadcast %285 : vector<8x1xf32> to vector<8x16xf32>
    %305 = arith.mulf %303, %304 : vector<8x16xf32>
    %306 = vector.broadcast %287 : vector<8x1xf32> to vector<8x16xf32>
    %307 = arith.addf %305, %306 : vector<8x16xf32>
    %c2_151 = arith.constant 2 : index
    %c0_152 = arith.constant 0 : index
    %c0_153 = arith.constant 0 : index
    %308 = vector.load %arg15[%c2_151, %c0_152, %c0_153] : memref<3x16x8xf32, #tpu.memory_space<vmem>>, vector<1x16x8xf32>
    %309 = vector.shape_cast %308 : vector<1x16x8xf32> to vector<16x8xf32>
    %cst_154 = arith.constant dense<0.000000e+00> : vector<16x16xf32>
    %310 = tpu.matmul %309, %307, %cst_154 {dimension_numbers = #tpu.dot_dimension_numbers<[1], [0], [0], [1], [0, 0, 1, 1], [], []>} : vector<16x8xf32>, vector<8x16xf32>, vector<16x16xf32> -> vector<16x16xf32>
    %c2_155 = arith.constant 2 : index
    %c0_156 = arith.constant 0 : index
    %c0_157 = arith.constant 0 : index
    %311 = vector.load %arg16[%c2_155, %c0_156, %c0_157] : memref<3x16x1xf32, #tpu.memory_space<vmem>>, vector<1x16x1xf32>
    %312 = vector.shape_cast %311 : vector<1x16x1xf32> to vector<16x1xf32>
    %313 = vector.broadcast %312 : vector<16x1xf32> to vector<16x16xf32>
    %314 = arith.addf %310, %313 : vector<16x16xf32>
    %cst_158 = arith.constant 0.000000e+00 : f32
    %315 = vector.broadcast %cst_158 : f32 to vector<16x16xf32>
    %316 = arith.maximumf %314, %315 : vector<16x16xf32>
    %c2_159 = arith.constant 2 : index
    %c0_160 = arith.constant 0 : index
    %c0_161 = arith.constant 0 : index
    %317 = vector.load %arg17[%c2_159, %c0_160, %c0_161] : memref<3x8x16xf32, #tpu.memory_space<vmem>>, vector<1x8x16xf32>
    %318 = vector.shape_cast %317 : vector<1x8x16xf32> to vector<8x16xf32>
    %cst_162 = arith.constant dense<0.000000e+00> : vector<8x16xf32>
    %319 = tpu.matmul %318, %316, %cst_162 {dimension_numbers = #tpu.dot_dimension_numbers<[1], [0], [0], [1], [0, 0, 1, 1], [], []>} : vector<8x16xf32>, vector<16x16xf32>, vector<8x16xf32> -> vector<8x16xf32>
    %c2_163 = arith.constant 2 : index
    %c0_164 = arith.constant 0 : index
    %c0_165 = arith.constant 0 : index
    %320 = vector.load %arg18[%c2_163, %c0_164, %c0_165] : memref<3x8x1xf32, #tpu.memory_space<vmem>>, vector<1x8x1xf32>
    %321 = vector.shape_cast %320 : vector<1x8x1xf32> to vector<8x1xf32>
    %322 = vector.broadcast %321 : vector<8x1xf32> to vector<8x16xf32>
    %323 = arith.addf %319, %322 : vector<8x16xf32>
    %324 = arith.addf %307, %323 : vector<8x16xf32>
    %c2_166 = arith.constant 2 : index
    %c0_167 = arith.constant 0 : index
    %c0_168 = arith.constant 0 : index
    %325 = vector.load %arg13[%c2_166, %c0_167, %c0_168] : memref<3x8x1xf32, #tpu.memory_space<vmem>>, vector<1x8x1xf32>
    %326 = vector.shape_cast %325 : vector<1x8x1xf32> to vector<8x1xf32>
    %c2_169 = arith.constant 2 : index
    %c0_170 = arith.constant 0 : index
    %c0_171 = arith.constant 0 : index
    %327 = vector.load %arg14[%c2_169, %c0_170, %c0_171] : memref<3x8x1xf32, #tpu.memory_space<vmem>>, vector<1x8x1xf32>
    %328 = vector.shape_cast %327 : vector<1x8x1xf32> to vector<8x1xf32>
    %cst_172 = arith.constant dense<0.000000e+00> : vector<16xf32>
    %329 = vector.multi_reduction <add>, %324, %cst_172 [0] : vector<8x16xf32> to vector<16xf32>
    %330 = vector.shape_cast %329 : vector<16xf32> to vector<1x16xf32>
    %cst_173 = arith.constant 8.000000e+00 : f32
    %331 = vector.broadcast %cst_173 : f32 to vector<1x16xf32>
    %332 = arith.divf %330, %331 : vector<1x16xf32>
    %333 = vector.broadcast %332 : vector<1x16xf32> to vector<8x16xf32>
    %334 = arith.subf %324, %333 : vector<8x16xf32>
    %335 = arith.mulf %334, %334 : vector<8x16xf32>
    %cst_174 = arith.constant dense<0.000000e+00> : vector<16xf32>
    %336 = vector.multi_reduction <add>, %335, %cst_174 [0] : vector<8x16xf32> to vector<16xf32>
    %337 = vector.shape_cast %336 : vector<16xf32> to vector<1x16xf32>
    %cst_175 = arith.constant 8.000000e+00 : f32
    %338 = vector.broadcast %cst_175 : f32 to vector<1x16xf32>
    %339 = arith.divf %337, %338 : vector<1x16xf32>
    %cst_176 = arith.constant 9.99999974E-6 : f32
    %340 = vector.broadcast %cst_176 : f32 to vector<1x16xf32>
    %341 = arith.addf %339, %340 : vector<1x16xf32>
    %342 = math.rsqrt %341 : vector<1x16xf32>
    %343 = vector.broadcast %342 : vector<1x16xf32> to vector<8x16xf32>
    %344 = arith.mulf %334, %343 : vector<8x16xf32>
    %345 = vector.broadcast %326 : vector<8x1xf32> to vector<8x16xf32>
    %346 = arith.mulf %344, %345 : vector<8x16xf32>
    %347 = vector.broadcast %328 : vector<8x1xf32> to vector<8x16xf32>
    %348 = arith.addf %346, %347 : vector<8x16xf32>
    %cst_177 = arith.constant dense<0.000000e+00> : vector<8x4xf32>
    %349 = tpu.matmul %348, %12, %cst_177 {dimension_numbers = #tpu.dot_dimension_numbers<[1], [0], [0], [1], [0, 0, 1, 1], [], []>} : vector<8x16xf32>, vector<16x4xf32>, vector<8x4xf32> -> vector<8x4xf32>
    %c0_178 = arith.constant 0 : index
    %c0_179 = arith.constant 0 : index
    %350 = vector.load %arg19[%c0_178, %c0_179] : memref<16x8xf32, #tpu.memory_space<vmem>>, vector<16x8xf32>
    %cst_180 = arith.constant dense<0.000000e+00> : vector<16x4xf32>
    %351 = tpu.matmul %350, %349, %cst_180 {dimension_numbers = #tpu.dot_dimension_numbers<[1], [0], [0], [1], [0, 0, 1, 1], [], []>} : vector<16x8xf32>, vector<8x4xf32>, vector<16x4xf32> -> vector<16x4xf32>
    %c0_181 = arith.constant 0 : index
    %c0_182 = arith.constant 0 : index
    %352 = vector.load %arg20[%c0_181, %c0_182] : memref<16x1xf32, #tpu.memory_space<vmem>>, vector<16x1xf32>
    %353 = vector.broadcast %352 : vector<16x1xf32> to vector<16x4xf32>
    %354 = arith.addf %351, %353 : vector<16x4xf32>
    %cst_183 = arith.constant 0.000000e+00 : f32
    %355 = vector.broadcast %cst_183 : f32 to vector<16x4xf32>
    %356 = arith.maximumf %354, %355 : vector<16x4xf32>
    %cst_184 = arith.constant dense<0.000000e+00> : vector<16x2xf32>
    %357 = tpu.matmul %356, %25, %cst_184 {dimension_numbers = #tpu.dot_dimension_numbers<[1], [0], [0], [1], [0, 0, 1, 1], [], []>} : vector<16x4xf32>, vector<4x2xf32>, vector<16x2xf32> -> vector<16x2xf32>
    %c0_185 = arith.constant 0 : index
    %c0_186 = arith.constant 0 : index
    %358 = vector.load %arg21[%c0_185, %c0_186] : memref<20x16xf32, #tpu.memory_space<vmem>>, vector<20x16xf32>
    %c0_187 = arith.constant 0 : index
    %c0_188 = arith.constant 0 : index
    %359 = vector.load %arg1[%c0_187, %c0_188] : memref<16x2xf32, #tpu.memory_space<vmem>>, vector<16x2xf32>
    %cst_189 = arith.constant dense<0.000000e+00> : vector<20x2xf32>
    %360 = tpu.matmul %358, %359, %cst_189 {dimension_numbers = #tpu.dot_dimension_numbers<[1], [0], [0], [1], [0, 0, 1, 1], [], []>} : vector<20x16xf32>, vector<16x2xf32>, vector<20x2xf32> -> vector<20x2xf32>
    %c0_190 = arith.constant 0 : index
    %c0_191 = arith.constant 0 : index
    %361 = vector.load %arg22[%c0_190, %c0_191] : memref<20x16xf32, #tpu.memory_space<vmem>>, vector<20x16xf32>
    %cst_192 = arith.constant dense<0.000000e+00> : vector<20x2xf32>
    %362 = tpu.matmul %361, %357, %cst_192 {dimension_numbers = #tpu.dot_dimension_numbers<[1], [0], [0], [1], [0, 0, 1, 1], [], []>} : vector<20x16xf32>, vector<16x2xf32>, vector<20x2xf32> -> vector<20x2xf32>
    %363 = arith.addf %360, %362 : vector<20x2xf32>
    %c0_193 = arith.constant 0 : index
    %c0_194 = arith.constant 0 : index
    %364 = vector.load %arg23[%c0_193, %c0_194] : memref<20x4xf32, #tpu.memory_space<vmem>>, vector<20x4xf32>
    %c0_195 = arith.constant 0 : index
    %c0_196 = arith.constant 0 : index
    %365 = vector.load %arg2[%c0_195, %c0_196] : memref<4x2xf32, #tpu.memory_space<vmem>>, vector<4x2xf32>
    %cst_197 = arith.constant dense<0.000000e+00> : vector<20x2xf32>
    %366 = tpu.matmul %364, %365, %cst_197 {dimension_numbers = #tpu.dot_dimension_numbers<[1], [0], [0], [1], [0, 0, 1, 1], [], []>} : vector<20x4xf32>, vector<4x2xf32>, vector<20x2xf32> -> vector<20x2xf32>
    %367 = arith.addf %363, %366 : vector<20x2xf32>
    %c0_198 = arith.constant 0 : index
    %c0_199 = arith.constant 0 : index
    %368 = vector.load %arg4[%c0_198, %c0_199] : memref<2x5xf32, #tpu.memory_space<vmem>>, vector<2x5xf32>
    %cst_200 = arith.constant dense<0.000000e+00> : vector<20x5xf32>
    %369 = tpu.matmul %367, %368, %cst_200 {dimension_numbers = #tpu.dot_dimension_numbers<[1], [0], [0], [1], [0, 0, 1, 1], [], []>} : vector<20x2xf32>, vector<2x5xf32>, vector<20x5xf32> -> vector<20x5xf32>
    %c0_201 = arith.constant 0 : index
    %c0_202 = arith.constant 0 : index
    %370 = vector.load %arg24[%c0_201, %c0_202] : memref<20x6xf32, #tpu.memory_space<vmem>>, vector<20x6xf32>
    %c0_203 = arith.constant 0 : index
    %c0_204 = arith.constant 0 : index
    %371 = vector.load %arg3[%c0_203, %c0_204] : memref<6x5xf32, #tpu.memory_space<vmem>>, vector<6x5xf32>
    %cst_205 = arith.constant dense<0.000000e+00> : vector<20x5xf32>
    %372 = tpu.matmul %370, %371, %cst_205 {dimension_numbers = #tpu.dot_dimension_numbers<[1], [0], [0], [1], [0, 0, 1, 1], [], []>} : vector<20x6xf32>, vector<6x5xf32>, vector<20x5xf32> -> vector<20x5xf32>
    %373 = arith.addf %369, %372 : vector<20x5xf32>
    %c0_206 = arith.constant 0 : index
    %c0_207 = arith.constant 0 : index
    %374 = vector.load %arg25[%c0_206, %c0_207] : memref<20x1xf32, #tpu.memory_space<vmem>>, vector<20x1xf32>
    %375 = vector.broadcast %374 : vector<20x1xf32> to vector<20x5xf32>
    %376 = arith.addf %373, %375 : vector<20x5xf32>
    %cst_208 = arith.constant 0.000000e+00 : f32
    %377 = vector.broadcast %cst_208 : f32 to vector<20x5xf32>
    %378 = arith.maximumf %376, %377 : vector<20x5xf32>
    %c0_209 = arith.constant 0 : index
    %c0_210 = arith.constant 0 : index
    %379 = vector.load %arg26[%c0_209, %c0_210] : memref<1x20xf32, #tpu.memory_space<vmem>>, vector<1x20xf32>
    %cst_211 = arith.constant dense<0.000000e+00> : vector<1x5xf32>
    %380 = tpu.matmul %379, %378, %cst_211 {dimension_numbers = #tpu.dot_dimension_numbers<[1], [0], [0], [1], [0, 0, 1, 1], [], []>} : vector<1x20xf32>, vector<20x5xf32>, vector<1x5xf32> -> vector<1x5xf32>
    %c0_212 = arith.constant 0 : index
    %c0_213 = arith.constant 0 : index
    %381 = vector.load %arg27[%c0_212, %c0_213] : memref<1x1xf32, #tpu.memory_space<vmem>>, vector<1x1xf32>
    %382 = vector.broadcast %381 : vector<1x1xf32> to vector<1x5xf32>
    %383 = arith.addf %380, %382 : vector<1x5xf32>
    %c0_214 = arith.constant 0 : index
    %c0_215 = arith.constant 0 : index
    %384 = vector.load %arg28[%c0_214, %c0_215] : memref<1x5xf32, #tpu.memory_space<vmem>>, vector<1x5xf32>
    tpu.vector_store %arg28[%c0_214, %c0_215], %383 {strides = array<i32>} : memref<1x5xf32, #tpu.memory_space<vmem>>, vector<1x5xf32>,
    return
  }
}

</mosaic_0001>

<bundles_post_ra>
// kernel: tpu_custom_call.1
= control target key start
LH: loop header
LB: loop body
LE: loop exit
PB: predicated region body
PF: predicated region fallthrough
CT: control target
= control target key end

     0   :  { %s7117_s0 = inlined_call_operand.vmem [shape: f32[4,16], index: 0, kind: input, shape index: {}]   ;;  %s7118_s1 = inlined_call_operand.vmem [shape: f32[16,2], index: 1, kind: input, shape index: {}]   ;;  %s7119_s2 = inlined_call_operand.vmem [shape: f32[4,2], index: 2, kind: input, shape index: {}]   ;;  %s7120_s3 = inlined_call_operand.vmem [shape: f32[6,5], index: 3, kind: input, shape index: {}]   ;;  %s7121_s4 = inlined_call_operand.vmem [shape: f32[2,5], index: 4, kind: input, shape index: {}]   ;;  %s7122_s5 = inlined_call_operand.vmem [shape: f32[8,4], index: 5, kind: input, shape index: {}]   ;;  %s7123_s6 = inlined_call_operand.vmem [shape: f32[8,1], index: 6, kind: input, shape index: {}]   ;;  %s7124_s7 = inlined_call_operand.vmem [shape: f32[3,24,8], index: 7, kind: input, shape index: {}]   ;;  %s7125_s8 = inlined_call_operand.vmem [shape: f32[3,24,1], index: 8, kind: input, shape index: {}]   ;;  %s7126_s9 = inlined_call_operand.vmem [shape: f32[3,8,8], index: 9, kind: input, shape index: {}]   ;;  %s7127_s10 = inlined_call_operand.vmem [shape: f32[3,8,1], index: 10, kind: input, shape index: {}]   ;;  %s7128_s11 = inlined_call_operand.vmem [shape: f32[3,8,1], index: 11, kind: input, shape index: {}]   ;;  %s7129_s12 = inlined_call_operand.vmem [shape: f32[3,8,1], index: 12, kind: input, shape index: {}]   ;;  %s7130_s13 = inlined_call_operand.vmem [shape: f32[3,8,1], index: 13, kind: input, shape index: {}]   ;;  %s7131_s14 = inlined_call_operand.vmem [shape: f32[3,8,1], index: 14, kind: input, shape index: {}]   ;;  %s7132_s15 = inlined_call_operand.vmem [shape: f32[3,16,8], index: 15, kind: input, shape index: {}]   ;;  %s7133_s16 = inlined_call_operand.vmem [shape: f32[3,16,1], index: 16, kind: input, shape index: {}]   ;;  %s7134_s17 = inlined_call_operand.vmem [shape: f32[3,8,16], index: 17, kind: input, shape index: {}]   ;;  %s7135_s18 = inlined_call_operand.vmem [shape: f32[3,8,1], index: 18, kind: input, shape index: {}]   ;;  %s7136_s19 = inlined_call_operand.vmem [shape: f32[16,8], index: 19, kind: input, shape index: {}]   ;;  %s7137_s20 = inlined_call_operand.vmem [shape: f32[16,1], index: 20, kind: input, shape index: {}]   ;;  %s7138_s21 = inlined_call_operand.vmem [shape: f32[20,16], index: 21, kind: input, shape index: {}]   ;;  %s7139_s22 = inlined_call_operand.vmem [shape: f32[20,16], index: 22, kind: input, shape index: {}]   ;;  %s7140_s23 = inlined_call_operand.vmem [shape: f32[20,4], index: 23, kind: input, shape index: {}]   ;;  %s7141_s24 = inlined_call_operand.vmem [shape: f32[20,6], index: 24, kind: input, shape index: {}]   ;;  %s7142_s25 = inlined_call_operand.vmem [shape: f32[20,1], index: 25, kind: input, shape index: {}]   ;;  %s7143_s26 = inlined_call_operand.vmem [shape: f32[1,20], index: 26, kind: input, shape index: {}]   ;;  %s7144_s27 = inlined_call_operand.<no memory space> [shape: f32[1,1], index: 27, kind: input, shape index: {}]   ;;  %s7145_s28 = inlined_call_operand.hbm [shape: f32[1,5], index: 28, kind: output, shape index: {}]  }
   0x1   :  { %7153 = sst [smem:[#allocation6_spill]] %s7117_s0  ;;  %v33_v0 = vstv %s7144_s27 }
   0x2   :  { %7154 = sst [smem:[#allocation7_spill]] %s7118_s1  ;;  %34 = vst [vmem:[#allocation2] sm:$0x1] %v33_v0 }
   0x3   :  { %7155 = sst [smem:[#allocation8_spill]] %s7119_s2 }
   0x4   :  { %7156 = sst [smem:[#allocation9_spill]] %s7120_s3 }
   0x5   :  { %7157 = sst [smem:[#allocation10_spill]] %s7121_s4 }
   0x6   :  { %7158 = sst [smem:[#allocation11_spill]] %s7122_s5 }
   0x7   :  { %7159 = sst [smem:[#allocation12_spill]] %s7123_s6 }
   0x8   :  { %7160 = sst [smem:[#allocation13_spill]] %s7124_s7 }
   0x9   :  { %7161 = sst [smem:[#allocation14_spill]] %s7125_s8 }
   0xa   :  { %7162 = sst [smem:[#allocation15_spill]] %s7126_s9 }
   0xb   :  { %7163 = sst [smem:[#allocation16_spill]] %s7127_s10 }
   0xc   :  { %7164 = sst [smem:[#allocation17_spill]] %s7128_s11 }
   0xd   :  { %7165 = sst [smem:[#allocation18_spill]] %s7129_s12 }
   0xe   :  { %v92_v1 = vlaneseq  ;;  %s7166_s3 = sld [smem:[#allocation12_spill]]  ;;  %v6185_v3 = vmov 0.0   ;;  %v6186_v6 = vmov 0   ;;  %vm6187_vm0 = vmmov 0  }
   0xf   :  { %5644 = vmatprep.subr.mxu1 %v6185_v3  ;;  %6051 = vset.pattern.permute.xlu0 %v6186_v6 }
  0x10   :  { %v6344_v4 = vshrl.u32 %v92_v1, 7  ;;  %v6346_v5 = vand.u32 127, %v92_v1  ;;  %5646 = vmatprep.mubr.msk.f32.mxu1 %vm6187_vm0, %v6185_v3 }
  0x14   :  { %v205_v2 = vld [vmem:[%s7166_s3] sm:$0xff] }
  0x15   :  { %35 = vsyncpa [#allocation4], 0  ;;  %208 = vperm.xlu0 %6051, %v205_v2   ;;  %6052 = vset.pattern.permute.xlu1 %v6186_v6  ;;  %v94_v7 = vadd.s32 8, %v6344_v4  ;;  %v97_v8 = vmul.u32 4, %v6346_v5  ;;  %v6353_v9 = vadd.s32 1, %v6346_v5  ;;  %s7167_s10 = sld [smem:[#allocation14_spill]] }
  0x16   :  { %vm117_vm1 = vcmask 31744   ;;  %s7170_s29 = sld [smem:[#allocation6_spill]]  ;;  %vm214_vm10 = vcmask 1043456   ;;  %s7171_s12 = sld [smem:[#allocation11_spill]]  ;;  %vm309_vm11 = vcmask 64512   ;;  %vm497_vm12 = vcmask 1041408  }
  0x17   :  { %vm98_vm2 = vcmp.ge.s32.totalorder %v6344_v4, %v97_v8  ;;  %v101_v11 = vmul.u32 4, %v6353_v9  ;;  %vm99_vm3 = vcmp.ge.s32.totalorder %v94_v7, %v97_v8  ;;  %vm5958_vm6 = vmpackc.low %vm117_vm1, %vm117_vm1  ;;  %s7172_s9 = sld [smem:[#allocation13_spill]]  ;;  %v6188_v27 = vmov 1983009808   ;;  %s7173_s7 = sld [smem:[#allocation16_spill]] }
  0x18   :  { %v403_v28 = vunpack.c.l.s4 %v6188_v27  ;;  %vm490_vm13 = vcmask 15360   ;;  %vm920_vm14 = vcmask 130048   ;;  %s7174_s4 = sld [smem:[#allocation17_spill]]  ;;  %s7175_s27 = sld [smem:[#allocation18_spill]] }
  0x19   :  { %vm102_vm4 = vcmp.lt.s32.totalorder %v6344_v4, %v101_v11  ;;  %vm103_vm5 = vcmp.lt.s32.totalorder %v94_v7, %v101_v11  ;;  %vm6530_vm15 = vmpackc.low %vm920_vm14, %vm920_vm14  ;;  %s7179_s2 = sld [smem:[#allocation9_spill]] }
  0x1a   :  { %vm104_vm7 = vmand %vm98_vm2, %vm102_vm4  ;;  %v404_v29 = vunpack.c.0.s8 %v403_v28 }
  0x1b   :  { %v291_v10 = vld [vmem:[%s7167_s10] sm:$0xff]  ;;  %vm105_vm8 = vmand %vm99_vm3, %vm103_vm5  ;;  %v5315_v12 = vsel %vm104_vm7, 1.0, %v6185_v3  ;;  %v292_v18 = vld [vmem:[%s7167_s10 + $0x8] sm:$0xff]  ;;  %vm5011_vm5 = vcmask 1045504  }
  0x1c   :  { %296 = vperm.xlu0 %6051, %v291_v10   ;;  %v5316_v13 = vsel %vm105_vm8, 1.0, %v6185_v3  ;;  %vm6365_vm9 = vmpackc.low %vm105_vm8, %vm104_vm7  ;;  %5636 = vmatprep.mubr.msk.f32.mxu0 %vm117_vm1, %v5315_v12  ;;  %v204_v16 = vld [vmem:[%s7170_s29] sm:$0xf]  ;;  %v6405_v32 = vsub.s32 %v404_v29, %v6344_v4  ;;  %s7178_s29 = sld [smem:[#allocation15_spill]] }
  0x1d   :  { %v5957_v15 = vpack.c.bf16 %v5316_v13, %v5315_v12  ;;  %v203_v17 = vld [vmem:[%s7171_s12] sm:$0xff]  ;;  %301 = vperm.xlu1 %6052, %v292_v18   ;;  %v289_v26 = vld [vmem:[%s7172_s9 + $0x8] sm:$0xff]  ;;  %v290_v49 = vld [vmem:[%s7172_s9 + $0x10] sm:$0xff] }
  0x1e   :  { %v288_v25 = vld [vmem:[%s7172_s9] sm:$0xff] }
  0x1f   :  { %5959 = vmatprep.subr.msk.bf16.mxu0 %vm5958_vm6, %v5957_v15 }
  0x20   :  { %5962 = vmatpush3.bf16.xpose.msk.msra.mxu0 %vm5958_vm6, %v5957_v15  ;;  %vm5001_vm6 = vcmask 48128  }
  0x21   :  { %5639 = vmatprep.subr.mxu0 %v6185_v3 }
  0x27   :  { %5637 = vmatmul.mubr.msk.f32.vlgmr.msra.gmra.mrb[0].mxu0 %vm117_vm1, %v5316_v13 }
  0x28   :  { %5640 = vmatpush3.msk.msra.mxu0 %vm214_vm10, %v204_v16  ;;  %5641 = vmatprep.mubr.msk.f32.mxu0 %vm6187_vm0, %v6185_v3 }
  0x2b   :  { %5642 = vmatmul.mubr.msk.f32.vlgmr.msra.gmra.mrb[2].mxu0 %vm117_vm1, %v203_v17 }
  0x94   :  { %v209_v21 = vpop.permute.xlu0 %208 }
  0x9b   :  { %v297_v30 = vpop.permute.xlu0 %296 }
  0x9c   :  { %v302_v35 = vpop.permute.xlu1 %301 }
  0xfa   :  { %v6385_v19 = vpop.f32.mrb[0].mxu0 }
  0xfb   :  { %v6387_v20 = vpop.f32.mrb[1].mxu0  ;;  %v5323_v61 = vadd.f32 -1.0, %v6385_v19 }
  0xfc   :  { %v5322_v62 = vadd.f32 -1.0, %v6387_v20 }
  0xfd   :  { %v6439_v63 = vmul.f32 1e+30, %v5323_v61 }
  0xfe   :  { %v284_v22 = vpop.f32.mrb[2].mxu0  ;;  %v6441_v0 = vmul.f32 1e+30, %v5322_v62 }
  0xff   :  { %v6389_v23 = vadd.f32 %v284_v22, %v209_v21  ;;  %v5643_v24 = vpop.f32.mrb[3].mxu0 }
 0x101   :  { %5645 = vmatpush3.msra.mxu1 %v6389_v23 }
 0x102   :  { %5647 = vmatmul.mubr.msk.f32.vlgmr.msra.gmra.mrb[0].mxu1 %vm309_vm11, %v288_v25 }
 0x103   :  { %5649 = vmatprep.mubr.msk.f32.mxu1 %vm6187_vm0, %v6185_v3 }
 0x106   :  { %5650 = vmatmul.mubr.msk.f32.gmra.mrb[2].mxu1 %vm309_vm11, %v289_v26 }
 0x107   :  { %5652 = vmatprep.mubr.msk.f32.mxu1 %vm6187_vm0, %v6185_v3 }
 0x10a   :  { %5653 = vmatmul.mubr.msk.f32.gmra.mrb[4].mxu1 %vm309_vm11, %v290_v49 }
 0x1d5   :  { %v385_v31 = vpop.f32.mrb[0].mxu1 }
 0x1d6   :  { %v386_v33 = vadd.f32 %v385_v31, %v297_v30  ;;  %v5648_v34 = vpop.f32.mrb[1].mxu1 }
 0x1d8   :  { %v399_v36 = vmul.f32 0.70710677, %v386_v33 }
 0x1d9   :  { %v390_v37 = vpop.f32.mrb[2].mxu1 }
 0x1da   :  { %v408_v38 = vrot.slane %v399_v36, %v6405_v32  ;;  %v391_v39 = vadd.f32 %v390_v37, %v302_v35  ;;  %v5651_v40 = vpop.f32.mrb[3].mxu1  ;;  %v401_v44 = vcombine.high %v399_v36, %v399_v36 }
 0x1dc   :  { %458 = vxpose.xlu1.b32.start.end [1/1] (short) (narrow) %v408_v38, 16  ;;  %v416_v41 = vcombine.high %v408_v38, %v408_v38  ;;  %v423_v42 = vcombine.high %v391_v39, %v391_v39  ;;  %v430_v43 = vrot.slane %v391_v39, %v6405_v32  ;;  %v415_v47 = vrot.slane %v401_v44, %v6405_v32 }
 0x1dd   :  { %v6435_v59 = vpop.f32.mrb[4].mxu1 }
 0x1de   :  { %575 = vxpose.xlu0.b32.start.end [1/1] (short) (narrow) %v416_v41, 16  ;;  %v437_v45 = vrot.slane %v423_v42, %v6405_v32  ;;  %v438_v46 = vcombine.high %v430_v43, %v430_v43  ;;  %5655 = vmatprep.subr.msk.mxu0 %vm497_vm12, %v430_v43  ;;  %v417_v48 = vcombine.high %v415_v47, %v415_v47  ;;  %v5654_v60 = vpop.f32.mrb[5].mxu1 }
 0x1df   :  { %5656 = vmatpush3.msk.msra.mxu0 %vm497_vm12, %v430_v43 }
 0x1e0   :  { %5665 = vmatprep.subr.msk.mxu1 %vm497_vm12, %v437_v45  ;;  %5660 = vmatprep.subr.msk.mxu0 %vm497_vm12, %v438_v46  ;;  %v439_v53 = vcombine.high %v437_v45, %v437_v45 }
 0x1e1   :  { %5666 = vmatpush3.msk.msra.mxu1 %vm497_vm12, %v437_v45 }
 0x1e3   :  { %690 = vxpose.xlu0.b32.start.end [1/1] (short) (narrow) %v415_v47, 16 }
 0x1e8   :  { %805 = vxpose.xlu0.b32.start.end [1/1] (short) (narrow) %v417_v48, 16 }
 0x25c   :  { %v474_v50 = vpop.trf.xlu1 }
 0x25d   :  { %5657 = vmatprep.mubr.msk.f32.mxu0 %vm490_vm13, %v474_v50 }
 0x25e   :  { %v591_v51 = vpop.trf.xlu0 }
 0x260   :  { %v475_v52 = vpop.trf.xlu1 }
 0x261   :  { %5658 = vmatmul.mubr.msk.f32.vlgmr.msra.gmra.mrb[4].mxu0 %vm490_vm13, %v475_v52 }
 0x262   :  { %5661 = vmatpush3.msk.msra.mxu0 %vm497_vm12, %v438_v46  ;;  %v592_v54 = vpop.trf.xlu0  ;;  %5662 = vmatprep.mubr.msk.f32.mxu0 %vm490_vm13, %v591_v51 }
 0x263   :  { %5670 = vmatprep.subr.msk.mxu0 %vm497_vm12, %v439_v53 }
 0x265   :  { %5663 = vmatmul.mubr.msk.f32.vlgmr.msra.gmra.mrb[6].mxu0 %vm490_vm13, %v592_v54 }
 0x266   :  { %5671 = vmatpush3.msk.msra.mxu0 %vm497_vm12, %v439_v53  ;;  %v706_v55 = vpop.trf.xlu0 }
 0x267   :  { %5667 = vmatprep.mubr.msk.f32.mxu1 %vm490_vm13, %v706_v55 }
 0x26a   :  { %v707_v56 = vpop.trf.xlu0 }
 0x26b   :  { %5668 = vmatmul.mubr.msk.f32.vlgmr.msra.gmra.mrb[6].mxu1 %vm490_vm13, %v707_v56 }
 0x26c   :  { %5679 = vmatprep.mubr.msk.f32.mxu1 %vm6187_vm0, %v6185_v3 }
 0x26e   :  { %v821_v57 = vpop.trf.xlu0 }
 0x26f   :  { %5672 = vmatprep.mubr.msk.f32.mxu0 %vm490_vm13, %v821_v57 }
 0x272   :  { %v822_v58 = vpop.trf.xlu0 }
 0x273   :  { %5673 = vmatmul.mubr.msk.f32.vlgmr.msra.gmra.mrb[8].mxu0 %vm490_vm13, %v822_v58 }
 0x274   :  { %5686 = vmatprep.mubr.msk.f32.mxu0 %vm6187_vm0, %v6185_v3 }
 0x334   :  { %v5659_v1 = vpop.f32.mrb[4].mxu0 }
 0x335   :  { %v572_v2 = vadd.f32 %v5659_v1, %v6439_v63  ;;  %v566_v6 = vpop.f32.mrb[5].mxu0 }
 0x336   :  { %v567_v7 = vadd.f32 %v566_v6, %v6441_v0 }
 0x337   :  { %v924_v8 = vsel %vm920_vm14, %v572_v2, -inf }
 0x338   :  { %925 = vmax.xlane.f32.xlu0 %v924_v8  ;;  %v5664_v10 = vpop.f32.mrb[6].mxu0  ;;  %v921_v11 = vsel %vm920_vm14, %v567_v7, -inf }
 0x339   :  { %v687_v12 = vadd.f32 %v5664_v10, %v6439_v63  ;;  %v681_v13 = vpop.f32.mrb[7].mxu0  ;;  %922 = vmax.xlane.f32.xlu1 %v921_v11 }
 0x33a   :  { %v682_v16 = vadd.f32 %v681_v13, %v6441_v0 }
 0x33b   :  { %v930_v15 = vsel %vm920_vm14, %v687_v12, -inf }
 0x33c   :  { %v927_v21 = vsel %vm920_vm14, %v682_v16, -inf }
 0x33d   :  { %931 = vmax.xlane.f32.xlu1 %v930_v15 }
 0x33e   :  { %v5669_v17 = vpop.f32.mrb[6].mxu1 }
 0x33f   :  { %v802_v18 = vadd.f32 %v5669_v17, %v6439_v63  ;;  %v796_v19 = vpop.f32.mrb[7].mxu1  ;;  %v293_v17 = vld [vmem:[%s7167_s10 + $0x10] sm:$0xff] }
 0x340   :  { %v797_v20 = vadd.f32 %v796_v19, %v6441_v0  ;;  %v1424_v19 = vld [vmem:[%s7174_s4] sm:$0xff] }
 0x341   :  { %928 = vmax.xlane.f32.xlu1 %v927_v21  ;;  %v936_v22 = vsel %vm920_vm14, %v802_v18, -inf  ;;  %v1425_v21 = vld [vmem:[%s7175_s27] sm:$0xff] }
 0x342   :  { %937 = vmax.xlane.f32.xlu0 %v936_v22  ;;  %v933_v24 = vsel %vm920_vm14, %v797_v20, -inf  ;;  %v1558_v22 = vld [vmem:[%s7135_s18] sm:$0xff] }
 0x345   :  { %934 = vmax.xlane.f32.xlu1 %v933_v24  ;;  %v1463_v24 = vld [vmem:[%s7133_s16 + $0x8] sm:$0xff] }
 0x346   :  { %v5674_v25 = vpop.f32.mrb[8].mxu0 }
 0x347   :  { %v917_v26 = vadd.f32 %v5674_v25, %v6439_v63  ;;  %v911_v27 = vpop.f32.mrb[9].mxu0  ;;  %v1639_v25 = vld [vmem:[%s7131_s14] sm:$0xff] }
 0x348   :  { %v912_v28 = vadd.f32 %v911_v27, %v6441_v0  ;;  %v5361_v27 = vld [vmem:[%s7167_s10 + $0x20] sm:$0xff] }
 0x349   :  { %v942_v29 = vsel %vm920_vm14, %v917_v26, -inf }
 0x34a   :  { %943 = vmax.xlane.f32.xlu0 %v942_v29  ;;  %v939_v30 = vsel %vm920_vm14, %v912_v28, -inf }
 0x34b   :  { %940 = vmax.xlane.f32.xlu1 %v939_v30 }
 0x3c5   :  { %v926_v31 = vpop.xlane.xlu0 %925 }
 0x3c6   :  { %v946_v33 = vsub.f32 %v572_v2, %v926_v31  ;;  %v923_v34 = vpop.xlane.xlu1 %922 }
 0x3c7   :  { %v945_v35 = vsub.f32 %v567_v7, %v923_v34 }
 0x3c8   :  { %v955_v36 = vmul.f32 1.442695, %v946_v33 }
 0x3c9   :  { %v953_v37 = vmul.f32 1.442695, %v945_v35 }
 0x3ca   :  { %6053 = vpow2.f32 %v955_v36  ;;  %v932_v38 = vpop.xlane.xlu1 %931 }
 0x3cb   :  { %6055 = vpow2.f32 %v953_v37  ;;  %v948_v39 = vsub.f32 %v687_v12, %v932_v38 }
 0x3cd   :  { %v959_v40 = vmul.f32 1.442695, %v948_v39 }
 0x3ce   :  { %v929_v41 = vpop.xlane.xlu1 %928 }
 0x3cf   :  { %6057 = vpow2.f32 %v959_v40  ;;  %v938_v42 = vpop.xlane.xlu0 %937  ;;  %v947_v44 = vsub.f32 %v682_v16, %v929_v41  ;;  %v6189_v16 = vmov 0.0|0.0  }
 0x3d0   :  { %v950_v43 = vsub.f32 %v802_v18, %v938_v42  ;;  %5963 = vmatprep.subr.bf16.mxu1 %v6189_v16  ;;  %5967 = vmatprep.subr.bf16.mxu0 %v6189_v16  ;;  %v1322_v18 = vld [vmem:[%s7173_s7] sm:$0xff] }
 0x3d1   :  { %v957_v50 = vmul.f32 1.442695, %v947_v44 }
 0x3d2   :  { %v963_v45 = vmul.f32 1.442695, %v950_v43  ;;  %v935_v46 = vpop.xlane.xlu1 %934 }
 0x3d3   :  { %v949_v47 = vsub.f32 %v797_v20, %v935_v46  ;;  %v1462_v20 = vld [vmem:[%s7133_s16] sm:$0xff] }
 0x3d4   :  { %v6459_v48 = vpop.eup %6053  ;;  %6059 = vpow2.f32 %v963_v45 }
 0x3d5   :  { %v6461_v49 = vpop.eup %6055  ;;  %v961_v51 = vmul.f32 1.442695, %v949_v47  ;;  %v972_v52 = vsel %vm920_vm14, %v6459_v48, 0.0 }
 0x3d6   :  { %973 = vadd.xlane.f32.xlu0 %v972_v52  ;;  %v969_v53 = vsel %vm920_vm14, %v6461_v49, 0.0 }
 0x3d7   :  { %6061 = vpow2.f32 %v961_v51  ;;  %v944_v54 = vpop.xlane.xlu0 %943  ;;  %970 = vadd.xlane.f32.xlu1 %v969_v53 }
 0x3d8   :  { %v952_v55 = vsub.f32 %v917_v26, %v944_v54  ;;  %v941_v56 = vpop.xlane.xlu1 %940  ;;  %6063 = vpow2.f32 %v957_v50  ;;  %v1638_v26 = vld [vmem:[%s7130_s13] sm:$0xff] }
 0x3d9   :  { %v6467_v57 = vpop.eup %6057  ;;  %v951_v58 = vsub.f32 %v912_v28, %v941_v56  ;;  %v5360_v28 = vld [vmem:[%s7167_s10 + $0x18] sm:$0xff] }
 0x3da   :  { %v967_v60 = vmul.f32 1.442695, %v952_v55  ;;  %v978_v61 = vsel %vm920_vm14, %v6467_v57, 0.0 }
 0x3db   :  { %v965_v62 = vmul.f32 1.442695, %v951_v58  ;;  %979 = vadd.xlane.f32.xlu0 %v978_v61 }
 0x3dc   :  { %6065 = vpow2.f32 %v967_v60 }
 0x3dd   :  { %6067 = vpow2.f32 %v965_v62 }
 0x3de   :  { %v6471_v1 = vpop.eup %6059 }
 0x3df   :  { %v984_v2 = vsel %vm920_vm14, %v6471_v1, 0.0 }
 0x3e0   :  { %985 = vadd.xlane.f32.xlu0 %v984_v2 }
 0x3e1   :  { %v6475_v6 = vpop.eup %6061 }
 0x3e2   :  { %v981_v7 = vsel %vm920_vm14, %v6475_v6, 0.0  ;;  %v6479_v8 = vpop.eup %6063 }
 0x3e3   :  { %982 = vadd.xlane.f32.xlu1 %v981_v7  ;;  %v975_v11 = vsel %vm920_vm14, %v6479_v8, 0.0 }
 0x3e6   :  { %v6481_v10 = vpop.eup %6065 }
 0x3e7   :  { %v6485_v12 = vpop.eup %6067  ;;  %976 = vadd.xlane.f32.xlu1 %v975_v11  ;;  %v990_v13 = vsel %vm920_vm14, %v6481_v10, 0.0 }
 0x3e8   :  { %991 = vadd.xlane.f32.xlu0 %v990_v13  ;;  %v987_v15 = vsel %vm920_vm14, %v6485_v12, 0.0 }
 0x3eb   :  { %988 = vadd.xlane.f32.xlu1 %v987_v15 }
 0x3fc   :  { %306 = vperm.xlu1 %6052, %v293_v17  }
 0x3fe   :  { %1325 = vperm.xlu0 %6051, %v1322_v18  }
 0x400   :  { %1450 = vperm.xlu1 %6052, %v1424_v19  }
 0x402   :  { %1466 = vperm.xlu0 %6051, %v1462_v20  }
 0x404   :  { %1456 = vperm.xlu1 %6052, %v1425_v21  }
 0x406   :  { %1561 = vperm.xlu0 %6051, %v1558_v22  }
 0x408   :  { %1471 = vperm.xlu1 %6052, %v1463_v24   ;;  %v1321_v24 = vld [vmem:[%s7178_s29] sm:$0xff] }
 0x40a   :  { %1669 = vperm.xlu0 %6051, %v1639_v25   ;;  %v1460_v25 = vld [vmem:[%s7132_s15] sm:$0xff] }
 0x40c   :  { %1663 = vperm.xlu1 %6052, %v1638_v26  }
 0x40e   :  { %1688 = vperm.xlu0 %6051, %v5361_v27  }
 0x410   :  { %1683 = vperm.xlu1 %6052, %v5360_v28  }
 0x463   :  { %v974_v29 = vpop.xlane.xlu0 %973 }
 0x464   :  { %6069 = vrcp.f32 %v974_v29  ;;  %v971_v30 = vpop.xlane.xlu1 %970 }
 0x465   :  { %6071 = vrcp.f32 %v971_v30 }
 0x468   :  { %v980_v31 = vpop.xlane.xlu0 %979 }
 0x46d   :  { %v986_v33 = vpop.xlane.xlu0 %985 }
 0x46e   :  { %v6070_v34 = vpop.eup %6069  ;;  %6073 = vrcp.f32 %v986_v33 }
 0x46f   :  { %v6072_v35 = vpop.eup %6071  ;;  %v1002_v36 = vmul.f32 %v6070_v34, %v6459_v48 }
 0x470   :  { %v1001_v37 = vmul.f32 %v6072_v35, %v6461_v49  ;;  %v983_v38 = vpop.xlane.xlu1 %982 }
 0x471   :  { %6075 = vrcp.f32 %v983_v38 }
 0x472   :  { %v5964_v40 = vpack.c.bf16 %v1002_v36, %v1001_v37  ;;  %6077 = vrcp.f32 %v980_v31 }
 0x474   :  { %5966 = vmatpush3.bf16.xpose.msk.msra.mxu1 %vm6530_vm15, %v5964_v40  ;;  %v977_v41 = vpop.xlane.xlu1 %976 }
 0x475   :  { %6079 = vrcp.f32 %v977_v41  ;;  %5971 = vmatprep.subr.bf16.mxu1 %v6189_v16  ;;  %v992_v42 = vpop.xlane.xlu0 %991 }
 0x478   :  { %v989_v43 = vpop.xlane.xlu1 %988  ;;  %v6074_v44 = vpop.eup %6073 }
 0x479   :  { %6081 = vrcp.f32 %v989_v43  ;;  %v1006_v46 = vmul.f32 %v6074_v44, %v6471_v1 }
 0x47a   :  { %6083 = vrcp.f32 %v992_v42 }
 0x47b   :  { %v6076_v45 = vpop.eup %6075 }
 0x47c   :  { %v1005_v47 = vmul.f32 %v6076_v45, %v6475_v6  ;;  %v307_v48 = vpop.permute.xlu1 %306  ;;  %v6078_v49 = vpop.eup %6077 }
 0x47d   :  { %v396_v50 = vadd.f32 %v6435_v59, %v307_v48  ;;  %v1004_v54 = vmul.f32 %v6078_v49, %v6467_v57  ;;  %v1326_v26 = vpop.permute.xlu0 %1325 }
 0x47e   :  { %v5972_v51 = vpack.c.bf16 %v1006_v46, %v1005_v47 }
 0x47f   :  { %v6080_v52 = vpop.eup %6079  ;;  %v448_v53 = vrot.slane %v396_v50, %v6405_v32  ;;  %v441_v60 = vcombine.high %v396_v50, %v396_v50 }
 0x480   :  { %v1003_v55 = vmul.f32 %v6080_v52, %v6479_v8 }
 0x481   :  { %5680 = vmatmul.mubr.msk.f32.vlgmr.msra.gmra.mrb[8].mxu1 %vm920_vm14, %v448_v53  ;;  %v455_v61 = vrot.slane %v441_v60, %v6405_v32  ;;  %v456_v1 = vcombine.high %v448_v53, %v448_v53 }
 0x482   :  { %5974 = vmatpush3.bf16.xpose.msk.msra.mxu1 %vm6530_vm15, %v5972_v51  ;;  %v5968_v56 = vpack.c.bf16 %v1004_v54, %v1003_v55  ;;  %5693 = vmatprep.mubr.msk.f32.mxu1 %vm6187_vm0, %v6185_v3  ;;  %v1451_v51 = vpop.permute.xlu1 %1450 }
 0x483   :  { %v6082_v58 = vpop.eup %6081  ;;  %5703 = vmatprep.subr.mxu1 %v6185_v3  ;;  %v457_v6 = vcombine.high %v455_v61, %v455_v61 }
 0x484   :  { %5970 = vmatpush3.bf16.xpose.msk.msra.mxu0 %vm6530_vm15, %v5968_v56  ;;  %v6084_v59 = vpop.eup %6083  ;;  %v1007_v57 = vmul.f32 %v6082_v58, %v6485_v12  ;;  %v1461_v58 = vld [vmem:[%s7132_s15 + $0x8] sm:$0xff] }
 0x485   :  { %5975 = vmatprep.subr.bf16.mxu0 %v6189_v16  ;;  %v1008_v62 = vmul.f32 %v6084_v59, %v6481_v10 }
 0x486   :  { %v1457_v55 = vpop.permute.xlu1 %1456 }
 0x487   :  { %v5976_v2 = vpack.c.bf16 %v1008_v62, %v1007_v57  ;;  %v1467_v57 = vpop.permute.xlu0 %1466 }
 0x489   :  { %5694 = vmatmul.mubr.msk.f32.vlgmr.msra.gmra.mrb[10].mxu1 %vm920_vm14, %v455_v61 }
 0x48a   :  { %5705 = vmatprep.mubr.msk.f32.mxu1 %vm6187_vm0, %v6185_v3  ;;  %v1472_v60 = vpop.permute.xlu1 %1471 }
 0x48b   :  { %5687 = vmatmul.mubr.msk.f32.vlgmr.msra.gmra.mrb[10].mxu0 %vm920_vm14, %v456_v1 }
 0x48c   :  { %5978 = vmatpush3.bf16.xpose.msk.msra.mxu0 %vm6530_vm15, %v5976_v2  ;;  %5700 = vmatprep.mubr.msk.f32.mxu0 %vm6187_vm0, %v6185_v3 }
 0x493   :  { %5701 = vmatmul.mubr.msk.f32.vlgmr.msra.gmra.mrb[12].mxu0 %vm920_vm14, %v457_v6 }
 0x494   :  { %5710 = vmatprep.mubr.msk.f32.mxu0 %vm309_vm11, %v1460_v25 }
 0x554   :  { %v1083_v7 = vpop.f32.mrb[8].mxu1 }
 0x555   :  { %v5681_v8 = vpop.f32.mrb[9].mxu1 }
 0x556   :  { %v1557_v8 = vld [vmem:[%s7134_s17] sm:$0xff] }
 0x55c   :  { %v1239_v10 = vpop.f32.mrb[10].mxu1 }
 0x55d   :  { %v5695_v11 = vpop.f32.mrb[11].mxu1 }
 0x55e   :  { %v1161_v12 = vpop.f32.mrb[10].mxu0 }
 0x55f   :  { %v1332_v13 = vcombine.low %v1083_v7, %v1161_v12  ;;  %v5688_v15 = vpop.f32.mrb[11].mxu0 }
 0x561   :  { %v1340_v20 = vrot.slane %v1332_v13, %v6405_v32 }
 0x566   :  { %v1317_v17 = vpop.f32.mrb[12].mxu0 }
 0x567   :  { %v1333_v18 = vcombine.low %v1239_v10, %v1317_v17  ;;  %v5702_v19 = vpop.f32.mrb[13].mxu0  ;;  %v1562_v10 = vpop.permute.xlu0 %1561 }
 0x569   :  { %v1347_v21 = vrot.slane %v1333_v18, %v6405_v32 }
 0x56b   :  { %v1348_v22 = vcombine.low %v1340_v20, %v1347_v21 }
 0x56d   :  { %5704 = vmatpush3.msra.mxu1 %v1348_v22 }
 0x56e   :  { %5706 = vmatmul.mubr.msk.f32.vlgmr.msra.gmra.mrb[12].mxu1 %vm309_vm11, %v1321_v24  ;;  %5979 = vmatprep.subr.bf16.mxu1 %v6189_v16 }
 0x56f   :  { %5717 = vmatprep.mubr.msk.f32.mxu1 %vm6187_vm0, %v6185_v3 }
 0x641   :  { %v1419_v27 = vpop.f32.mrb[12].mxu1 }
 0x642   :  { %v1420_v28 = vadd.f32 %v1419_v27, %v1326_v26  ;;  %v5707_v29 = vpop.f32.mrb[13].mxu1 }
 0x644   :  { %v1423_v30 = vadd.f32 %v1420_v28, %v6389_v23 }
 0x646   :  { %v1426_v31 = vsel %vm920_vm14, %v1423_v30, 0.0 }
 0x647   :  { %v1427_v33 = vrot.slane %v1426_v31, 4 }
 0x649   :  { %v1428_v34 = vadd.f32 %v1427_v33, %v1426_v31 }
 0x64b   :  { %v1429_v35 = vrot.slane %v1428_v34, 2 }
 0x64d   :  { %v1430_v36 = vadd.f32 %v1429_v35, %v1428_v34 }
 0x64f   :  { %v1431_v37 = vrot.slane %v1430_v36, 1 }
 0x651   :  { %v1432_v38 = vadd.f32 %v1431_v37, %v1430_v36 }
 0x653   :  { %v1434_v40 = vmul.f32 0.125, %v1432_v38 }
 0x655   :  { %v1435_v41 = vsub.f32 %v1423_v30, %v1434_v40 }
 0x657   :  { %v1436_v42 = vmul.f32 %v1435_v41, %v1435_v41 }
 0x659   :  { %v1437_v43 = vsel %vm920_vm14, %v1436_v42, 0.0 }
 0x65a   :  { %v1438_v44 = vrot.slane %v1437_v43, 4 }
 0x65c   :  { %v1439_v45 = vadd.f32 %v1438_v44, %v1437_v43  ;;  %v1670_v43 = vpop.permute.xlu0 %1669 }
 0x65e   :  { %v1440_v46 = vrot.slane %v1439_v45, 2 }
 0x660   :  { %v1441_v47 = vadd.f32 %v1440_v46, %v1439_v45  ;;  %v5357_v45 = vld [vmem:[%s7172_s9 + $0x18] sm:$0xff]  ;;  %v5358_v46 = vld [vmem:[%s7172_s9 + $0x20] sm:$0xff] }
 0x662   :  { %v1442_v48 = vrot.slane %v1441_v47, 1 }
 0x664   :  { %v1443_v49 = vadd.f32 %v1442_v48, %v1441_v47 }
 0x666   :  { %v1444_v23 = vmul.f32 0.125, %v1443_v49 }
 0x668   :  { %v1445_v50 = vadd.f32 1e-05, %v1444_v23 }
 0x66a   :  { %6085 = vrsqrt.f32 %v1445_v50 }
 0x674   :  { %v6086_v52 = vpop.eup %6085 }
 0x675   :  { %v1447_v53 = vmul.f32 %v6086_v52, %v1435_v41  ;;  %v1664_v41 = vpop.permute.xlu1 %1663 }
 0x677   :  { %v1453_v54 = vmul.f32 %v1451_v51, %v1447_v53  ;;  %v1689_v51 = vpop.permute.xlu0 %1688 }
 0x679   :  { %v1459_v56 = vadd.f32 %v1457_v55, %v1453_v54  ;;  %v1684_v47 = vpop.permute.xlu1 %1683 }
 0x67b   :  { %5708 = vmatprep.subr.mxu0 %v1459_v56 }
 0x67c   :  { %5709 = vmatpush3.msra.mxu0 %v1459_v56 }
 0x67d   :  { %5711 = vmatmul.mubr.msk.f32.vlgmr.msra.gmra.mrb[14].mxu0 %vm309_vm11, %v1461_v58  ;;  %5720 = vmatprep.subr.mxu0 %v6185_v3 }
 0x67e   :  { %5722 = vmatprep.mubr.msk.f32.mxu0 %vm6187_vm0, %v6185_v3 }
 0x750   :  { %v5712_v59 = vpop.f32.mrb[14].mxu0 }
 0x751   :  { %v1552_v61 = vadd.f32 %v5712_v59, %v1472_v60  ;;  %v1546_v62 = vpop.f32.mrb[15].mxu0 }
 0x752   :  { %v1547_v1 = vadd.f32 %v1546_v62, %v1467_v57 }
 0x753   :  { %v1556_v2 = vmax.f32 %v1552_v61, 0.0 }
 0x754   :  { %v1555_v6 = vmax.f32 %v1547_v1, 0.0 }
 0x756   :  { %v5980_v7 = vpack.c.bf16 %v1556_v2, %v1555_v6  ;;  %v5359_v6 = vld [vmem:[%s7172_s9 + $0x28] sm:$0xff] }
 0x758   :  { %5981 = vmatpush3.bf16.msra.mxu1 %v5980_v7 }
 0x75b   :  { %5718 = vmatmul.mubr.msk.f32.vlgmr.msra.gmra.mrb[14].mxu1 %vm920_vm14, %v1557_v8 }
 0x82e   :  { %v1633_v11 = vpop.f32.mrb[14].mxu1 }
 0x82f   :  { %v1634_v12 = vadd.f32 %v1633_v11, %v1562_v10  ;;  %v5719_v13 = vpop.f32.mrb[15].mxu1 }
 0x831   :  { %v1637_v15 = vadd.f32 %v1634_v12, %v1459_v56 }
 0x833   :  { %v1640_v17 = vsel %vm920_vm14, %v1637_v15, 0.0 }
 0x834   :  { %v1641_v18 = vrot.slane %v1640_v17, 4 }
 0x836   :  { %v1642_v19 = vadd.f32 %v1641_v18, %v1640_v17 }
 0x838   :  { %v1643_v20 = vrot.slane %v1642_v19, 2 }
 0x83a   :  { %v1644_v21 = vadd.f32 %v1643_v20, %v1642_v19 }
 0x83c   :  { %v1645_v22 = vrot.slane %v1644_v21, 1 }
 0x83e   :  { %v1646_v24 = vadd.f32 %v1645_v22, %v1644_v21 }
 0x840   :  { %v1647_v25 = vmul.f32 0.125, %v1646_v24 }
 0x842   :  { %v1648_v26 = vsub.f32 %v1637_v15, %v1647_v25 }
 0x844   :  { %v1649_v27 = vmul.f32 %v1648_v26, %v1648_v26 }
 0x846   :  { %v1650_v28 = vsel %vm920_vm14, %v1649_v27, 0.0 }
 0x847   :  { %v1651_v29 = vrot.slane %v1650_v28, 4 }
 0x849   :  { %v1652_v30 = vadd.f32 %v1651_v29, %v1650_v28 }
 0x84b   :  { %v1653_v31 = vrot.slane %v1652_v30, 2 }
 0x84d   :  { %v1654_v33 = vadd.f32 %v1653_v31, %v1652_v30 }
 0x84f   :  { %v1655_v34 = vrot.slane %v1654_v33, 1 }
 0x851   :  { %v1656_v35 = vadd.f32 %v1655_v34, %v1654_v33 }
 0x853   :  { %v1657_v36 = vmul.f32 0.125, %v1656_v35 }
 0x855   :  { %v1658_v37 = vadd.f32 1e-05, %v1657_v36 }
 0x857   :  { %6087 = vrsqrt.f32 %v1658_v37 }
 0x861   :  { %v6088_v38 = vpop.eup %6087 }
 0x862   :  { %v1660_v40 = vmul.f32 %v6088_v38, %v1648_v26 }
 0x864   :  { %v1666_v42 = vmul.f32 %v1664_v41, %v1660_v40 }
 0x866   :  { %v6593_v44 = vadd.f32 %v1670_v43, %v1666_v42 }
 0x868   :  { %5721 = vmatpush3.msra.mxu0 %v6593_v44 }
 0x869   :  { %5723 = vmatmul.mubr.msk.f32.vlgmr.msra.gmra.mrb[16].mxu0 %vm309_vm11, %v5357_v45 }
 0x86a   :  { %5725 = vmatprep.mubr.msk.f32.mxu0 %vm6187_vm0, %v6185_v3 }
 0x86d   :  { %5726 = vmatmul.mubr.msk.f32.gmra.mrb[18].mxu0 %vm309_vm11, %v5358_v46 }
 0x86e   :  { %5728 = vmatprep.mubr.msk.f32.mxu0 %vm6187_vm0, %v6185_v3 }
 0x871   :  { %5729 = vmatmul.mubr.msk.f32.gmra.mrb[20].mxu0 %vm309_vm11, %v5359_v6 }
 0x93c   :  { %v1771_v48 = vpop.f32.mrb[16].mxu0 }
 0x93d   :  { %v1772_v49 = vadd.f32 %v1771_v48, %v1684_v47  ;;  %v5724_v23 = vpop.f32.mrb[17].mxu0 }
 0x93f   :  { %v1785_v50 = vmul.f32 0.70710677, %v1772_v49 }
 0x940   :  { %v1776_v52 = vpop.f32.mrb[18].mxu0 }
 0x941   :  { %v1794_v53 = vrot.slane %v1785_v50, %v6405_v32  ;;  %v1777_v54 = vadd.f32 %v1776_v52, %v1689_v51  ;;  %v5727_v55 = vpop.f32.mrb[19].mxu0  ;;  %v1787_v59 = vcombine.high %v1785_v50, %v1785_v50 }
 0x943   :  { %v1802_v56 = vcombine.high %v1794_v53, %v1794_v53  ;;  %v1809_v58 = vcombine.high %v1777_v54, %v1777_v54  ;;  %v1816_v60 = vrot.slane %v1777_v54, %v6405_v32  ;;  %1844 = vxpose.xlu1.b32.start.end [1/1] (short) (narrow) %v1794_v53, 16  ;;  %v1801_v1 = vrot.slane %v1787_v59, %v6405_v32 }
 0x944   :  { %v6638_v18 = vpop.f32.mrb[20].mxu0 }
 0x945   :  { %v1823_v57 = vrot.slane %v1809_v58, %v6405_v32  ;;  %v1824_v61 = vcombine.high %v1816_v60, %v1816_v60  ;;  %5731 = vmatprep.subr.msk.mxu1 %vm497_vm12, %v1816_v60  ;;  %1959 = vxpose.xlu0.b32.start.end [1/1] (short) (narrow) %v1802_v56, 16  ;;  %v1803_v2 = vcombine.high %v1801_v1, %v1801_v1  ;;  %v5730_v19 = vpop.f32.mrb[21].mxu0 }
 0x946   :  { %5732 = vmatpush3.msk.msra.mxu1 %vm497_vm12, %v1816_v60 }
 0x947   :  { %5736 = vmatprep.subr.msk.mxu1 %vm497_vm12, %v1824_v61  ;;  %v1825_v62 = vcombine.high %v1823_v57, %v1823_v57 }
 0x949   :  { %5746 = vmatprep.subr.msk.mxu0 %vm497_vm12, %v1825_v62 }
 0x94a   :  { %5747 = vmatpush3.msk.msra.mxu0 %vm497_vm12, %v1825_v62  ;;  %2074 = vxpose.xlu0.b32.start.end [1/1] (short) (narrow) %v1801_v1, 16 }
 0x94b   :  { %5986 = vmatprep.subr.bf16.mxu0 %v6189_v16 }
 0x94f   :  { %2189 = vxpose.xlu0.b32.start.end [1/1] (short) (narrow) %v1803_v2, 16 }
 0x9c3   :  { %v1860_v7 = vpop.trf.xlu1 }
 0x9c4   :  { %5733 = vmatprep.mubr.msk.f32.mxu1 %vm490_vm13, %v1860_v7 }
 0x9c5   :  { %v1975_v8 = vpop.trf.xlu0 }
 0x9c7   :  { %v1861_v10 = vpop.trf.xlu1 }
 0x9c8   :  { %5734 = vmatmul.mubr.msk.f32.vlgmr.msra.gmra.mrb[16].mxu1 %vm490_vm13, %v1861_v10 }
 0x9c9   :  { %5737 = vmatpush3.msk.msra.mxu1 %vm497_vm12, %v1824_v61  ;;  %5738 = vmatprep.mubr.msk.f32.mxu1 %vm490_vm13, %v1975_v8  ;;  %v1976_v11 = vpop.trf.xlu0 }
 0x9ca   :  { %5741 = vmatprep.subr.msk.mxu1 %vm497_vm12, %v1823_v57 }
 0x9cc   :  { %5739 = vmatmul.mubr.msk.f32.vlgmr.msra.gmra.mrb[18].mxu1 %vm490_vm13, %v1976_v11 }
 0x9cd   :  { %5742 = vmatpush3.msk.msra.mxu1 %vm497_vm12, %v1823_v57  ;;  %v2090_v12 = vpop.trf.xlu0 }
 0x9ce   :  { %5743 = vmatprep.mubr.msk.f32.mxu1 %vm490_vm13, %v2090_v12  ;;  %5982 = vmatprep.subr.bf16.mxu1 %v6189_v16 }
 0x9d1   :  { %v2091_v13 = vpop.trf.xlu0 }
 0x9d2   :  { %5744 = vmatmul.mubr.msk.f32.vlgmr.msra.gmra.mrb[20].mxu1 %vm490_vm13, %v2091_v13 }
 0x9d3   :  { %5755 = vmatprep.mubr.msk.f32.mxu1 %vm6187_vm0, %v6185_v3 }
 0x9d5   :  { %v2205_v15 = vpop.trf.xlu0 }
 0x9d6   :  { %5748 = vmatprep.mubr.msk.f32.mxu0 %vm490_vm13, %v2205_v15 }
 0x9d9   :  { %v2206_v17 = vpop.trf.xlu0 }
 0x9da   :  { %5749 = vmatmul.mubr.msk.f32.vlgmr.msra.gmra.mrb[22].mxu0 %vm490_vm13, %v2206_v17 }
 0x9db   :  { %5762 = vmatprep.mubr.msk.f32.mxu0 %vm6187_vm0, %v6185_v3 }
 0xa9b   :  { %v5735_v20 = vpop.f32.mrb[16].mxu1 }
 0xa9c   :  { %v1956_v21 = vadd.f32 %v5735_v20, %v6439_v63  ;;  %v1950_v22 = vpop.f32.mrb[17].mxu1 }
 0xa9d   :  { %v1951_v24 = vadd.f32 %v1950_v22, %v6441_v0 }
 0xa9e   :  { %v2307_v25 = vsel %vm920_vm14, %v1956_v21, -inf }
 0xa9f   :  { %v5740_v26 = vpop.f32.mrb[18].mxu1  ;;  %2308 = vmax.xlane.f32.xlu0 %v2307_v25  ;;  %v2304_v27 = vsel %vm920_vm14, %v1951_v24, -inf }
 0xaa0   :  { %v2071_v28 = vadd.f32 %v5740_v26, %v6439_v63  ;;  %2305 = vmax.xlane.f32.xlu1 %v2304_v27  ;;  %v2065_v29 = vpop.f32.mrb[19].mxu1 }
 0xaa1   :  { %v2066_v31 = vadd.f32 %v2065_v29, %v6441_v0 }
 0xaa2   :  { %v2313_v30 = vsel %vm920_vm14, %v2071_v28, -inf }
 0xaa3   :  { %v2310_v37 = vsel %vm920_vm14, %v2066_v31, -inf }
 0xaa4   :  { %2314 = vmax.xlane.f32.xlu1 %v2313_v30 }
 0xaa5   :  { %v5745_v33 = vpop.f32.mrb[20].mxu1 }
 0xaa6   :  { %v2180_v34 = vpop.f32.mrb[21].mxu1  ;;  %v2186_v35 = vadd.f32 %v5745_v33, %v6439_v63 }
 0xaa7   :  { %v2181_v36 = vadd.f32 %v2180_v34, %v6441_v0  ;;  %v5391_v34 = vld [vmem:[%s7173_s7 + $0x8] sm:$0xff] }
 0xaa8   :  { %2311 = vmax.xlane.f32.xlu1 %v2310_v37  ;;  %v2319_v40 = vsel %vm920_vm14, %v2186_v35, -inf  ;;  %v5362_v37 = vld [vmem:[%s7167_s10 + $0x28] sm:$0xff] }
 0xaa9   :  { %v2316_v38 = vsel %vm920_vm14, %v2181_v36, -inf }
 0xaaa   :  { %2317 = vmax.xlane.f32.xlu0 %v2316_v38  ;;  %v5402_v38 = vld [vmem:[%s7135_s18 + $0x8] sm:$0xff] }
 0xaac   :  { %2320 = vmax.xlane.f32.xlu1 %v2319_v40  ;;  %v5394_v40 = vld [vmem:[%s7175_s27 + $0x8] sm:$0xff] }
 0xaad   :  { %v5750_v41 = vpop.f32.mrb[22].mxu0 }
 0xaae   :  { %v2301_v42 = vadd.f32 %v5750_v41, %v6439_v63  ;;  %v2295_v43 = vpop.f32.mrb[23].mxu0  ;;  %v5405_v41 = vld [vmem:[%s7131_s14 + $0x8] sm:$0xff] }
 0xaaf   :  { %v2296_v45 = vadd.f32 %v2295_v43, %v6441_v0  ;;  %v5410_v43 = vld [vmem:[%s7167_s10 + $0x38] sm:$0xff] }
 0xab0   :  { %v2325_v46 = vsel %vm920_vm14, %v2301_v42, -inf }
 0xab1   :  { %2326 = vmax.xlane.f32.xlu1 %v2325_v46  ;;  %v2322_v47 = vsel %vm920_vm14, %v2296_v45, -inf  ;;  %v5409_v46 = vld [vmem:[%s7167_s10 + $0x30] sm:$0xff] }
 0xab2   :  { %2323 = vmax.xlane.f32.xlu0 %v2322_v47 }
 0xb2c   :  { %v2309_v48 = vpop.xlane.xlu0 %2308 }
 0xb2d   :  { %v2329_v49 = vsub.f32 %v1956_v21, %v2309_v48  ;;  %v2306_v23 = vpop.xlane.xlu1 %2305 }
 0xb2e   :  { %v2328_v50 = vsub.f32 %v1951_v24, %v2306_v23 }
 0xb2f   :  { %v2338_v51 = vmul.f32 1.442695, %v2329_v49 }
 0xb30   :  { %v2336_v52 = vmul.f32 1.442695, %v2328_v50 }
 0xb31   :  { %6089 = vpow2.f32 %v2338_v51  ;;  %v2315_v53 = vpop.xlane.xlu1 %2314 }
 0xb32   :  { %6091 = vpow2.f32 %v2336_v52  ;;  %v2331_v54 = vsub.f32 %v2071_v28, %v2315_v53 }
 0xb34   :  { %v2342_v55 = vmul.f32 1.442695, %v2331_v54 }
 0xb35   :  { %v2312_v56 = vpop.xlane.xlu1 %2311 }
 0xb36   :  { %6093 = vpow2.f32 %v2342_v55  ;;  %v2330_v58 = vsub.f32 %v2066_v31, %v2312_v56 }
 0xb37   :  { %v2318_v62 = vpop.xlane.xlu0 %2317 }
 0xb38   :  { %v2340_v60 = vmul.f32 1.442695, %v2330_v58  ;;  %v2332_v8 = vsub.f32 %v2181_v36, %v2318_v62  ;;  %v5397_v36 = vld [vmem:[%s7133_s16 + $0x10] sm:$0xff] }
 0xb39   :  { %v2321_v59 = vpop.xlane.xlu1 %2320 }
 0xb3a   :  { %6095 = vpow2.f32 %v2340_v60  ;;  %v2333_v57 = vsub.f32 %v2186_v35, %v2321_v59  ;;  %v2344_v20 = vmul.f32 1.442695, %v2332_v8  ;;  %v5393_v35 = vld [vmem:[%s7174_s4 + $0x8] sm:$0xff] }
 0xb3b   :  { %v6656_v61 = vpop.eup %6089 }
 0xb3c   :  { %v6658_v1 = vpop.eup %6091  ;;  %v2346_v2 = vmul.f32 1.442695, %v2333_v57  ;;  %v2355_v6 = vsel %vm920_vm14, %v6656_v61, 0.0 }
 0xb3d   :  { %2356 = vadd.xlane.f32.xlu1 %v2355_v6  ;;  %v2352_v7 = vsel %vm920_vm14, %v6658_v1, 0.0 }
 0xb3e   :  { %6097 = vpow2.f32 %v2346_v2  ;;  %v2327_v10 = vpop.xlane.xlu1 %2326  ;;  %2353 = vadd.xlane.f32.xlu0 %v2352_v7 }
 0xb3f   :  { %v2335_v11 = vsub.f32 %v2301_v42, %v2327_v10  ;;  %v2324_v12 = vpop.xlane.xlu0 %2323  ;;  %v5398_v42 = vld [vmem:[%s7133_s16 + $0x18] sm:$0xff] }
 0xb40   :  { %v6664_v13 = vpop.eup %6093  ;;  %v2334_v15 = vsub.f32 %v2296_v45, %v2324_v12  ;;  %v5404_v45 = vld [vmem:[%s7130_s13 + $0x8] sm:$0xff] }
 0xb41   :  { %v2350_v17 = vmul.f32 1.442695, %v2335_v11  ;;  %v2361_v19 = vsel %vm920_vm14, %v6664_v13, 0.0 }
 0xb42   :  { %v2348_v21 = vmul.f32 1.442695, %v2334_v15  ;;  %2362 = vadd.xlane.f32.xlu1 %v2361_v19 }
 0xb43   :  { %6099 = vpow2.f32 %v2350_v17 }
 0xb44   :  { %v6096_v22 = vpop.eup %6095  ;;  %6101 = vpow2.f32 %v2348_v21 }
 0xb45   :  { %v2358_v24 = vsel %vm920_vm14, %v6096_v22, 0.0  ;;  %6103 = vpow2.f32 %v2344_v20 }
 0xb46   :  { %2359 = vadd.xlane.f32.xlu0 %v2358_v24 }
 0xb48   :  { %v6669_v25 = vpop.eup %6097 }
 0xb49   :  { %v2367_v26 = vsel %vm920_vm14, %v6669_v25, 0.0 }
 0xb4a   :  { %2368 = vadd.xlane.f32.xlu1 %v2367_v26 }
 0xb4d   :  { %v6673_v27 = vpop.eup %6099 }
 0xb4e   :  { %v6675_v28 = vpop.eup %6101  ;;  %v2373_v29 = vsel %vm920_vm14, %v6673_v27, 0.0 }
 0xb4f   :  { %2374 = vadd.xlane.f32.xlu1 %v2373_v29  ;;  %v2370_v30 = vsel %vm920_vm14, %v6675_v28, 0.0  ;;  %v6681_v31 = vpop.eup %6103 }
 0xb50   :  { %2371 = vadd.xlane.f32.xlu0 %v2370_v30  ;;  %v2364_v33 = vsel %vm920_vm14, %v6681_v31, 0.0 }
 0xb54   :  { %2365 = vadd.xlane.f32.xlu0 %v2364_v33 }
 0xb60   :  { %2710 = vperm.xlu1 %6052, %v5391_v34  }
 0xb64   :  { %2836 = vperm.xlu1 %6052, %v5393_v35  }
 0xb68   :  { %2854 = vperm.xlu1 %6052, %v5397_v36  }
 0xb6a   :  { %1693 = vperm.xlu0 %6051, %v5362_v37  }
 0xb6c   :  { %2951 = vperm.xlu1 %6052, %v5402_v38  }
 0xb6e   :  { %2842 = vperm.xlu0 %6051, %v5394_v40  }
 0xb70   :  { %3061 = vperm.xlu1 %6052, %v5405_v41   ;;  %v5390_v41 = vld [vmem:[%s7178_s29 + $0x8] sm:$0xff] }
 0xb72   :  { %2859 = vperm.xlu0 %6051, %v5398_v42   ;;  %v5395_v42 = vld [vmem:[%s7132_s15 + $0x10] sm:$0xff] }
 0xb74   :  { %3080 = vperm.xlu1 %6052, %v5410_v43  }
 0xb76   :  { %3055 = vperm.xlu0 %6051, %v5404_v45  }
 0xb7a   :  { %3075 = vperm.xlu0 %6051, %v5409_v46  }
 0xbca   :  { %v2357_v47 = vpop.xlane.xlu1 %2356 }
 0xbcb   :  { %6105 = vrcp.f32 %v2357_v47  ;;  %v2354_v48 = vpop.xlane.xlu0 %2353 }
 0xbcc   :  { %6107 = vrcp.f32 %v2354_v48 }
 0xbcf   :  { %v2363_v49 = vpop.xlane.xlu1 %2362 }
 0xbd0   :  { %6109 = vrcp.f32 %v2363_v49 }
 0xbd3   :  { %v2360_v23 = vpop.xlane.xlu0 %2359 }
 0xbd4   :  { %6111 = vrcp.f32 %v2360_v23 }
 0xbd5   :  { %v6106_v50 = vpop.eup %6105 }
 0xbd6   :  { %v6108_v51 = vpop.eup %6107  ;;  %v2385_v52 = vmul.f32 %v6106_v50, %v6656_v61 }
 0xbd7   :  { %v2384_v53 = vmul.f32 %v6108_v51, %v6658_v1  ;;  %v2369_v54 = vpop.xlane.xlu1 %2368 }
 0xbd9   :  { %v5983_v55 = vpack.c.bf16 %v2385_v52, %v2384_v53 }
 0xbda   :  { %v6110_v56 = vpop.eup %6109 }
 0xbdb   :  { %5985 = vmatpush3.bf16.xpose.msk.msra.mxu1 %vm6530_vm15, %v5983_v55  ;;  %v2387_v57 = vmul.f32 %v6110_v56, %v6664_v13 }
 0xbdc   :  { %v2375_v58 = vpop.xlane.xlu1 %2374  ;;  %5990 = vmatprep.subr.bf16.mxu1 %v6189_v16 }
 0xbdd   :  { %6113 = vrcp.f32 %v2375_v58  ;;  %v2372_v60 = vpop.xlane.xlu0 %2371 }
 0xbde   :  { %v6112_v59 = vpop.eup %6111  ;;  %6115 = vrcp.f32 %v2372_v60 }
 0xbdf   :  { %v2386_v62 = vmul.f32 %v6112_v59, %v6096_v22  ;;  %6117 = vrcp.f32 %v2369_v54 }
 0xbe0   :  { %v2711_v43 = vpop.permute.xlu1 %2710 }
 0xbe1   :  { %v2366_v61 = vpop.xlane.xlu0 %2365  ;;  %v5987_v2 = vpack.c.bf16 %v2387_v57, %v2386_v62 }
 0xbe2   :  { %6119 = vrcp.f32 %v2366_v61 }
 0xbe3   :  { %5989 = vmatpush3.bf16.xpose.msk.msra.mxu0 %vm6530_vm15, %v5987_v2 }
 0xbe4   :  { %5994 = vmatprep.subr.bf16.mxu0 %v6189_v16 }
 0xbe7   :  { %v6114_v1 = vpop.eup %6113 }
 0xbe8   :  { %v6116_v6 = vpop.eup %6115  ;;  %v2391_v11 = vmul.f32 %v6114_v1, %v6673_v27 }
 0xbe9   :  { %v1694_v7 = vpop.permute.xlu0 %1693  ;;  %v6118_v8 = vpop.eup %6117  ;;  %v2390_v12 = vmul.f32 %v6116_v6, %v6675_v28 }
 0xbea   :  { %v1782_v10 = vadd.f32 %v6638_v18, %v1694_v7  ;;  %v2389_v17 = vmul.f32 %v6118_v8, %v6669_v25 }
 0xbeb   :  { %v5995_v22 = vpack.c.bf16 %v2391_v11, %v2390_v12 }
 0xbec   :  { %v6120_v13 = vpop.eup %6119  ;;  %v1834_v15 = vrot.slane %v1782_v10, %v6405_v32  ;;  %v1827_v20 = vcombine.high %v1782_v10, %v1782_v10  ;;  %v2837_v10 = vpop.permute.xlu1 %2836 }
 0xbed   :  { %v2388_v19 = vmul.f32 %v6120_v13, %v6681_v31  ;;  %v2843_v12 = vpop.permute.xlu0 %2842 }
 0xbee   :  { %v1842_v21 = vcombine.high %v1834_v15, %v1834_v15  ;;  %5756 = vmatmul.mubr.msk.f32.vlgmr.msra.gmra.mrb[22].mxu1 %vm920_vm14, %v1834_v15  ;;  %v1841_v18 = vrot.slane %v1827_v20, %v6405_v32  ;;  %v5396_v15 = vld [vmem:[%s7132_s15 + $0x18] sm:$0xff] }
 0xbef   :  { %v5991_v24 = vpack.c.bf16 %v2389_v17, %v2388_v19  ;;  %5769 = vmatprep.mubr.msk.f32.mxu1 %vm6187_vm0, %v6185_v3 }
 0xbf0   :  { %5763 = vmatmul.mubr.msk.f32.vlgmr.msra.gmra.mrb[24].mxu0 %vm920_vm14, %v1842_v21  ;;  %v1843_v25 = vcombine.high %v1841_v18, %v1841_v18  ;;  %v2855_v20 = vpop.permute.xlu1 %2854 }
 0xbf1   :  { %5997 = vmatpush3.bf16.xpose.msk.msra.mxu0 %vm6530_vm15, %v5995_v22  ;;  %5993 = vmatpush3.bf16.xpose.msk.msra.mxu1 %vm6530_vm15, %v5991_v24  ;;  %v2860_v17 = vpop.permute.xlu0 %2859 }
 0xbf2   :  { %5776 = vmatprep.mubr.msk.f32.mxu0 %vm6187_vm0, %v6185_v3  ;;  %5779 = vmatprep.subr.mxu1 %v6185_v3 }
 0xbf8   :  { %5777 = vmatmul.mubr.msk.f32.vlgmr.msra.gmra.mrb[26].mxu0 %vm920_vm14, %v1843_v25  ;;  %5770 = vmatmul.mubr.msk.f32.vlgmr.msra.gmra.mrb[24].mxu1 %vm920_vm14, %v1841_v18 }
 0xbf9   :  { %5781 = vmatprep.mubr.msk.f32.mxu1 %vm6187_vm0, %v6185_v3  ;;  %5786 = vmatprep.mubr.msk.f32.mxu0 %vm309_vm11, %v5395_v42 }
 0xcc1   :  { %v2466_v26 = vpop.f32.mrb[22].mxu1 }
 0xcc2   :  { %v5757_v27 = vpop.f32.mrb[23].mxu1 }
 0xcc3   :  { %v2544_v28 = vpop.f32.mrb[24].mxu0  ;;  %v5401_v27 = vld [vmem:[%s7134_s17 + $0x8] sm:$0xff] }
 0xcc4   :  { %v2717_v29 = vcombine.low %v2466_v26, %v2544_v28  ;;  %v5764_v30 = vpop.f32.mrb[25].mxu0  ;;  %v2952_v28 = vpop.permute.xlu1 %2951 }
 0xcc6   :  { %v2725_v37 = vrot.slane %v2717_v29, %v6405_v32 }
 0xccb   :  { %v2700_v31 = vpop.f32.mrb[26].mxu0  ;;  %v2622_v33 = vpop.f32.mrb[24].mxu1 }
 0xccc   :  { %v2718_v34 = vcombine.low %v2622_v33, %v2700_v31  ;;  %v5778_v35 = vpop.f32.mrb[27].mxu0  ;;  %v5771_v36 = vpop.f32.mrb[25].mxu1 }
 0xcce   :  { %v2732_v38 = vrot.slane %v2718_v34, %v6405_v32 }
 0xcd0   :  { %v2733_v40 = vcombine.low %v2725_v37, %v2732_v38 }
 0xcd2   :  { %5780 = vmatpush3.msra.mxu1 %v2733_v40 }
 0xcd3   :  { %5782 = vmatmul.mubr.msk.f32.vlgmr.msra.gmra.mrb[26].mxu1 %vm309_vm11, %v5390_v41  ;;  %5998 = vmatprep.subr.bf16.mxu1 %v6189_v16 }
 0xcd4   :  { %5793 = vmatprep.mubr.msk.f32.mxu1 %vm6187_vm0, %v6185_v3 }
 0xda6   :  { %v2804_v45 = vpop.f32.mrb[26].mxu1 }
 0xda7   :  { %v2805_v46 = vadd.f32 %v2804_v45, %v2711_v43  ;;  %v5783_v47 = vpop.f32.mrb[27].mxu1 }
 0xda9   :  { %v2808_v48 = vadd.f32 %v2805_v46, %v6593_v44 }
 0xdab   :  { %v2813_v49 = vsel %vm920_vm14, %v2808_v48, 0.0 }
 0xdac   :  { %v2814_v23 = vrot.slane %v2813_v49, 4 }
 0xdae   :  { %v2815_v50 = vadd.f32 %v2814_v23, %v2813_v49 }
 0xdb0   :  { %v2816_v51 = vrot.slane %v2815_v50, 2 }
 0xdb2   :  { %v2817_v52 = vadd.f32 %v2816_v51, %v2815_v50 }
 0xdb4   :  { %v2818_v53 = vrot.slane %v2817_v52, 1 }
 0xdb6   :  { %v2819_v54 = vadd.f32 %v2818_v53, %v2817_v52 }
 0xdb8   :  { %v2820_v55 = vmul.f32 0.125, %v2819_v54 }
 0xdba   :  { %v2821_v56 = vsub.f32 %v2808_v48, %v2820_v55 }
 0xdbc   :  { %v2822_v58 = vmul.f32 %v2821_v56, %v2821_v56 }
 0xdbe   :  { %v2823_v60 = vsel %vm920_vm14, %v2822_v58, 0.0 }
 0xdbf   :  { %v2824_v59 = vrot.slane %v2823_v60, 4 }
 0xdc1   :  { %v2825_v57 = vadd.f32 %v2824_v59, %v2823_v60  ;;  %v3062_v60 = vpop.permute.xlu1 %3061 }
 0xdc3   :  { %v2826_v62 = vrot.slane %v2825_v57, 2 }
 0xdc5   :  { %v2827_v61 = vadd.f32 %v2826_v62, %v2825_v57  ;;  %v5406_v57 = vld [vmem:[%s7172_s9 + $0x30] sm:$0xff]  ;;  %v5407_v62 = vld [vmem:[%s7172_s9 + $0x38] sm:$0xff] }
 0xdc7   :  { %v2828_v2 = vrot.slane %v2827_v61, 1 }
 0xdc9   :  { %v2829_v1 = vadd.f32 %v2828_v2, %v2827_v61 }
 0xdcb   :  { %v2830_v44 = vmul.f32 0.125, %v2829_v1 }
 0xdcd   :  { %v2831_v6 = vadd.f32 1e-05, %v2830_v44 }
 0xdcf   :  { %6121 = vrsqrt.f32 %v2831_v6 }
 0xdd9   :  { %v6122_v7 = vpop.eup %6121 }
 0xdda   :  { %v2833_v8 = vmul.f32 %v6122_v7, %v2821_v56  ;;  %v3056_v56 = vpop.permute.xlu0 %3055  ;;  %v3081_v7 = vpop.permute.xlu1 %3080 }
 0xddc   :  { %v2839_v11 = vmul.f32 %v2837_v10, %v2833_v8 }
 0xdde   :  { %v2845_v13 = vadd.f32 %v2843_v12, %v2839_v11  ;;  %v3076_v61 = vpop.permute.xlu0 %3075 }
 0xde0   :  { %5784 = vmatprep.subr.mxu0 %v2845_v13 }
 0xde1   :  { %5785 = vmatpush3.msra.mxu0 %v2845_v13 }
 0xde2   :  { %5787 = vmatmul.mubr.msk.f32.vlgmr.msra.gmra.mrb[28].mxu0 %vm309_vm11, %v5396_v15  ;;  %5796 = vmatprep.subr.mxu0 %v6185_v3 }
 0xde3   :  { %5798 = vmatprep.mubr.msk.f32.mxu0 %vm6187_vm0, %v6185_v3 }
 0xeb5   :  { %v5788_v19 = vpop.f32.mrb[28].mxu0 }
 0xeb6   :  { %v2940_v21 = vadd.f32 %v5788_v19, %v2860_v17  ;;  %v2934_v22 = vpop.f32.mrb[29].mxu0 }
 0xeb7   :  { %v2935_v24 = vadd.f32 %v2934_v22, %v2855_v20 }
 0xeb8   :  { %v2944_v18 = vmax.f32 %v2940_v21, 0.0 }
 0xeb9   :  { %v2943_v25 = vmax.f32 %v2935_v24, 0.0 }
 0xebb   :  { %v5999_v26 = vpack.c.bf16 %v2944_v18, %v2943_v25  ;;  %v5408_v25 = vld [vmem:[%s7172_s9 + $0x40] sm:$0xff] }
 0xebd   :  { %6000 = vmatpush3.bf16.msra.mxu1 %v5999_v26 }
 0xec0   :  { %5794 = vmatmul.mubr.msk.f32.vlgmr.msra.gmra.mrb[28].mxu1 %vm920_vm14, %v5401_v27 }
 0xf93   :  { %v3023_v29 = vpop.f32.mrb[28].mxu1 }
 0xf94   :  { %v3024_v30 = vadd.f32 %v3023_v29, %v2952_v28  ;;  %v5795_v31 = vpop.f32.mrb[29].mxu1 }
 0xf96   :  { %v3027_v33 = vadd.f32 %v3024_v30, %v2845_v13 }
 0xf98   :  { %v3032_v34 = vsel %vm920_vm14, %v3027_v33, 0.0 }
 0xf99   :  { %v3033_v35 = vrot.slane %v3032_v34, 4 }
 0xf9b   :  { %v3034_v36 = vadd.f32 %v3033_v35, %v3032_v34 }
 0xf9d   :  { %v3035_v37 = vrot.slane %v3034_v36, 2 }
 0xf9f   :  { %v3036_v38 = vadd.f32 %v3035_v37, %v3034_v36 }
 0xfa1   :  { %v3037_v40 = vrot.slane %v3036_v38, 1 }
 0xfa3   :  { %v3038_v41 = vadd.f32 %v3037_v40, %v3036_v38 }
 0xfa5   :  { %v3039_v42 = vmul.f32 0.125, %v3038_v41 }
 0xfa7   :  { %v3040_v43 = vsub.f32 %v3027_v33, %v3039_v42 }
 0xfa9   :  { %v3041_v45 = vmul.f32 %v3040_v43, %v3040_v43 }
 0xfab   :  { %v3042_v46 = vsel %vm920_vm14, %v3041_v45, 0.0 }
 0xfac   :  { %v3043_v47 = vrot.slane %v3042_v46, 4 }
 0xfae   :  { %v3044_v48 = vadd.f32 %v3043_v47, %v3042_v46 }
 0xfb0   :  { %v3045_v49 = vrot.slane %v3044_v48, 2 }
 0xfb2   :  { %v3046_v23 = vadd.f32 %v3045_v49, %v3044_v48 }
 0xfb4   :  { %v3047_v50 = vrot.slane %v3046_v23, 1 }
 0xfb6   :  { %v3048_v51 = vadd.f32 %v3047_v50, %v3046_v23 }
 0xfb8   :  { %v3049_v52 = vmul.f32 0.125, %v3048_v51 }
 0xfba   :  { %v3050_v53 = vadd.f32 1e-05, %v3049_v52 }
 0xfbc   :  { %6123 = vrsqrt.f32 %v3050_v53 }
 0xfc6   :  { %v6124_v54 = vpop.eup %6123 }
 0xfc7   :  { %v3052_v55 = vmul.f32 %v6124_v54, %v3040_v43 }
 0xfc9   :  { %v3058_v58 = vmul.f32 %v3056_v56, %v3052_v55 }
 0xfcb   :  { %v6778_v59 = vadd.f32 %v3062_v60, %v3058_v58 }
 0xfcd   :  { %5797 = vmatpush3.msra.mxu0 %v6778_v59 }
 0xfce   :  { %5799 = vmatmul.mubr.msk.f32.vlgmr.msra.gmra.mrb[30].mxu0 %vm309_vm11, %v5406_v57 }
 0xfcf   :  { %5801 = vmatprep.mubr.msk.f32.mxu0 %vm6187_vm0, %v6185_v3 }
 0xfd2   :  { %5802 = vmatmul.mubr.msk.f32.gmra.mrb[32].mxu0 %vm309_vm11, %v5407_v62 }
 0xfd3   :  { %5804 = vmatprep.mubr.msk.f32.mxu0 %vm6187_vm0, %v6185_v3 }
 0xfd6   :  { %5805 = vmatmul.mubr.msk.f32.gmra.mrb[34].mxu0 %vm309_vm11, %v5408_v25 }
0x10a1   :  { %v3163_v2 = vpop.f32.mrb[30].mxu0 }
0x10a2   :  { %v3164_v1 = vadd.f32 %v3163_v2, %v3076_v61  ;;  %v5800_v44 = vpop.f32.mrb[31].mxu0 }
0x10a4   :  { %v3177_v6 = vmul.f32 0.70710677, %v3164_v1 }
0x10a5   :  { %v3168_v8 = vpop.f32.mrb[32].mxu0 }
0x10a6   :  { %v3186_v10 = vrot.slane %v3177_v6, %v6405_v32  ;;  %v3169_v11 = vadd.f32 %v3168_v8, %v3081_v7  ;;  %v5803_v12 = vpop.f32.mrb[33].mxu0  ;;  %v3179_v13 = vcombine.high %v3177_v6, %v3177_v6 }
0x10a8   :  { %v3194_v15 = vcombine.high %v3186_v10, %v3186_v10  ;;  %v3201_v17 = vcombine.high %v3169_v11, %v3169_v11  ;;  %v3208_v19 = vrot.slane %v3169_v11, %v6405_v32  ;;  %3236 = vxpose.xlu0.b32.start.end [1/1] (short) (narrow) %v3186_v10, 16  ;;  %v3193_v22 = vrot.slane %v3179_v13, %v6405_v32 }
0x10a9   :  { %v6823_v35 = vpop.f32.mrb[34].mxu0 }
0x10aa   :  { %v3215_v20 = vrot.slane %v3201_v17, %v6405_v32  ;;  %v3216_v21 = vcombine.high %v3208_v19, %v3208_v19  ;;  %5807 = vmatprep.subr.msk.mxu1 %vm497_vm12, %v3208_v19  ;;  %3351 = vxpose.xlu1.b32.start.end [1/1] (short) (narrow) %v3194_v15, 16  ;;  %v3195_v18 = vcombine.high %v3193_v22, %v3193_v22  ;;  %v5806_v36 = vpop.f32.mrb[35].mxu0 }
0x10ab   :  { %5808 = vmatpush3.msk.msra.mxu1 %vm497_vm12, %v3208_v19 }
0x10ac   :  { %5812 = vmatprep.subr.msk.mxu1 %vm497_vm12, %v3216_v21  ;;  %v3217_v24 = vcombine.high %v3215_v20, %v3215_v20 }
0x10ad   :  { %3466 = vxpose.xlu0.b32.start.end [1/1] (short) (narrow) %v3193_v22, 16 }
0x10ae   :  { %5822 = vmatprep.subr.msk.mxu0 %vm497_vm12, %v3217_v24 }
0x10af   :  { %5823 = vmatpush3.msk.msra.mxu0 %vm497_vm12, %v3217_v24 }
0x10b0   :  { %6005 = vmatprep.subr.bf16.mxu0 %v6189_v16 }
0x10b2   :  { %3581 = vxpose.xlu0.b32.start.end [1/1] (short) (narrow) %v3195_v18, 16 }
0x1128   :  { %v3252_v26 = vpop.trf.xlu0 }
0x1129   :  { %5809 = vmatprep.mubr.msk.f32.mxu1 %vm490_vm13, %v3252_v26 }
0x112a   :  { %v3367_v27 = vpop.trf.xlu1 }
0x112c   :  { %v3253_v28 = vpop.trf.xlu0 }
0x112d   :  { %5810 = vmatmul.mubr.msk.f32.vlgmr.msra.gmra.mrb[30].mxu1 %vm490_vm13, %v3253_v28 }
0x112e   :  { %5813 = vmatpush3.msk.msra.mxu1 %vm497_vm12, %v3216_v21  ;;  %5814 = vmatprep.mubr.msk.f32.mxu1 %vm490_vm13, %v3367_v27  ;;  %v3368_v29 = vpop.trf.xlu1 }
0x112f   :  { %5817 = vmatprep.subr.msk.mxu1 %vm497_vm12, %v3215_v20 }
0x1130   :  { %v3482_v30 = vpop.trf.xlu0 }
0x1131   :  { %5815 = vmatmul.mubr.msk.f32.vlgmr.msra.gmra.mrb[32].mxu1 %vm490_vm13, %v3368_v29 }
0x1132   :  { %5818 = vmatpush3.msk.msra.mxu1 %vm497_vm12, %v3215_v20  ;;  %5819 = vmatprep.mubr.msk.f32.mxu1 %vm490_vm13, %v3482_v30 }
0x1133   :  { %6001 = vmatprep.subr.bf16.mxu1 %v6189_v16 }
0x1134   :  { %v3483_v31 = vpop.trf.xlu0 }
0x1135   :  { %5820 = vmatmul.mubr.msk.f32.vlgmr.msra.gmra.mrb[34].mxu1 %vm490_vm13, %v3483_v31 }
0x1136   :  { %5831 = vmatprep.mubr.msk.f32.mxu1 %vm6187_vm0, %v6185_v3 }
0x1138   :  { %v3597_v33 = vpop.trf.xlu0 }
0x1139   :  { %5824 = vmatprep.mubr.msk.f32.mxu0 %vm490_vm13, %v3597_v33 }
0x113c   :  { %v3598_v34 = vpop.trf.xlu0 }
0x113d   :  { %5825 = vmatmul.mubr.msk.f32.vlgmr.msra.gmra.mrb[36].mxu0 %vm490_vm13, %v3598_v34 }
0x113e   :  { %5838 = vmatprep.mubr.msk.f32.mxu0 %vm6187_vm0, %v6185_v3 }
0x1200   :  { %v5811_v37 = vpop.f32.mrb[30].mxu1 }
0x1201   :  { %v3348_v38 = vadd.f32 %v5811_v37, %v6439_v63  ;;  %v3342_v40 = vpop.f32.mrb[31].mxu1 }
0x1202   :  { %v3343_v41 = vadd.f32 %v3342_v40, %v6441_v0 }
0x1203   :  { %v3699_v42 = vsel %vm920_vm14, %v3348_v38, -inf }
0x1204   :  { %3700 = vmax.xlane.f32.xlu1 %v3699_v42  ;;  %v5816_v43 = vpop.f32.mrb[32].mxu1  ;;  %v3696_v45 = vsel %vm920_vm14, %v3343_v41, -inf }
0x1205   :  { %v3463_v46 = vadd.f32 %v5816_v43, %v6439_v63  ;;  %v3457_v47 = vpop.f32.mrb[33].mxu1  ;;  %3697 = vmax.xlane.f32.xlu0 %v3696_v45 }
0x1206   :  { %v3458_v48 = vadd.f32 %v3457_v47, %v6441_v0 }
0x1207   :  { %v3705_v49 = vsel %vm920_vm14, %v3463_v46, -inf }
0x1208   :  { %3706 = vmax.xlane.f32.xlu1 %v3705_v49  ;;  %v5821_v23 = vpop.f32.mrb[34].mxu1  ;;  %v3702_v53 = vsel %vm920_vm14, %v3458_v48, -inf  ;;  %v5440_v49 = vld [vmem:[%s7173_s7 + $0x10] sm:$0xff] }
0x1209   :  { %v3572_v50 = vpop.f32.mrb[35].mxu1  ;;  %v3578_v52 = vadd.f32 %v5821_v23, %v6439_v63  ;;  %v5442_v23 = vld [vmem:[%s7174_s4 + $0x10] sm:$0xff] }
0x120a   :  { %v3573_v51 = vadd.f32 %v3572_v50, %v6441_v0  ;;  %v5446_v50 = vld [vmem:[%s7133_s16 + $0x20] sm:$0xff] }
0x120b   :  { %v3711_v55 = vsel %vm920_vm14, %v3578_v52, -inf }
0x120c   :  { %3703 = vmax.xlane.f32.xlu1 %v3702_v53  ;;  %v3708_v54 = vsel %vm920_vm14, %v3573_v51, -inf  ;;  %v5443_v53 = vld [vmem:[%s7175_s27 + $0x10] sm:$0xff] }
0x120d   :  { %3709 = vmax.xlane.f32.xlu0 %v3708_v54  ;;  %v5454_v54 = vld [vmem:[%s7131_s14 + $0x10] sm:$0xff]  ;;  %s7180_s14 = sld [smem:[#allocation10_spill]] }
0x1210   :  { %3712 = vmax.xlane.f32.xlu1 %v3711_v55  ;;  %v5826_v56 = vpop.f32.mrb[36].mxu0  ;;  %v5447_v55 = vld [vmem:[%s7133_s16 + $0x28] sm:$0xff] }
0x1211   :  { %v3693_v58 = vadd.f32 %v5826_v56, %v6439_v63  ;;  %v3687_v60 = vpop.f32.mrb[37].mxu0  ;;  %v4533_v56 = vld [vmem:[%s7137_s20 + $0x8] sm:$0xff] }
0x1212   :  { %v3688_v57 = vadd.f32 %v3687_v60, %v6441_v0  ;;  %v5188_v60 = vld [vmem:[%s7142_s25 + $0x8] sm:$0xff] }
0x1213   :  { %v3717_v62 = vsel %vm920_vm14, %v3693_v58, -inf }
0x1214   :  { %3718 = vmax.xlane.f32.xlu1 %v3717_v62  ;;  %v3714_v61 = vsel %vm920_vm14, %v3688_v57, -inf  ;;  %v5212_v62 = vld [vmem:[#allocation2] sm:$0x1] }
0x1215   :  { %3715 = vmax.xlane.f32.xlu0 %v3714_v61  ;;  %v5187_v61 = vld [vmem:[%s7142_s25] sm:$0xff] }
0x1291   :  { %v3701_v2 = vpop.xlane.xlu1 %3700 }
0x1292   :  { %v3721_v1 = vsub.f32 %v3348_v38, %v3701_v2  ;;  %v3698_v44 = vpop.xlane.xlu0 %3697  ;;  %v5189_v2 = vld [vmem:[%s7142_s25 + $0x10] sm:$0xf]  ;;  %s7181_s25 = sld [smem:[#allocation7_spill]] }
0x1293   :  { %v3720_v6 = vsub.f32 %v3343_v41, %v3698_v44 }
0x1294   :  { %v3730_v7 = vmul.f32 1.442695, %v3721_v1 }
0x1295   :  { %v3728_v8 = vmul.f32 1.442695, %v3720_v6  ;;  %v3707_v10 = vpop.xlane.xlu1 %3706 }
0x1296   :  { %6125 = vpow2.f32 %v3730_v7  ;;  %v3723_v11 = vsub.f32 %v3463_v46, %v3707_v10 }
0x1297   :  { %6127 = vpow2.f32 %v3728_v8 }
0x1298   :  { %v3734_v63 = vmul.f32 1.442695, %v3723_v11 }
0x1299   :  { %v3704_v12 = vpop.xlane.xlu1 %3703 }
0x129a   :  { %6129 = vpow2.f32 %v3734_v63  ;;  %v3722_v0 = vsub.f32 %v3458_v48, %v3704_v12  ;;  %v3710_v17 = vpop.xlane.xlu0 %3709 }
0x129b   :  { %v3724_v24 = vsub.f32 %v3573_v51, %v3710_v17  ;;  %v5411_v51 = vld [vmem:[%s7167_s10 + $0x40] sm:$0xff]  ;;  %s7182_s10 = sld [smem:[#allocation8_spill]] }
0x129c   :  { %v3732_v13 = vmul.f32 1.442695, %v3722_v0 }
0x129d   :  { %v3713_v15 = vpop.xlane.xlu1 %3712  ;;  %v3736_v33 = vmul.f32 1.442695, %v3724_v24 }
0x129e   :  { %6131 = vpow2.f32 %v3732_v13  ;;  %v3725_v19 = vsub.f32 %v3578_v52, %v3713_v15  ;;  %v5451_v52 = vld [vmem:[%s7135_s18 + $0x10] sm:$0xff] }
0x12a0   :  { %v6841_v20 = vpop.eup %6125  ;;  %v3738_v21 = vmul.f32 1.442695, %v3725_v19 }
0x12a1   :  { %v6843_v22 = vpop.eup %6127  ;;  %v3719_v18 = vpop.xlane.xlu1 %3718  ;;  %v3747_v25 = vsel %vm920_vm14, %v6841_v20, 0.0 }
0x12a2   :  { %6133 = vpow2.f32 %v3738_v21  ;;  %v3727_v26 = vsub.f32 %v3693_v58, %v3719_v18  ;;  %3748 = vadd.xlane.f32.xlu1 %v3747_v25  ;;  %v3716_v27 = vpop.xlane.xlu0 %3715  ;;  %v3744_v28 = vsel %vm920_vm14, %v6843_v22, 0.0  ;;  %v5453_v58 = vld [vmem:[%s7130_s13 + $0x10] sm:$0xff]  ;;  %s6191_s13 = smov [#allocation3]  }
0x12a3   :  { %v3726_v29 = vsub.f32 %v3688_v57, %v3716_v27  ;;  %3745 = vadd.xlane.f32.xlu0 %v3744_v28  ;;  %v4532_v57 = vld [vmem:[%s7137_s20] sm:$0xff]  ;;  %s5307_s30 = sshll.u32 %s6191_s13, 4  ;;  %s5308_s30 = int_to_ptr.vmem [resolvable:$true] %s5307_s30 }
0x12a4   :  { %v6849_v30 = vpop.eup %6129  ;;  %v3742_v31 = vmul.f32 1.442695, %v3727_v26  ;;  %s6161_s20 = scalar_lea.vmem %s5308_s30, 16  ;;  %p6166_p1 = scmp.lt.s32.totalorder %s5308_s30, %s5308_s30 }
0x12a5   :  { %v3740_v34 = vmul.f32 1.442695, %v3726_v29  ;;  %v3753_v36 = vsel %vm920_vm14, %v6849_v30, 0.0  ;;  %p6162_p0 = scmp.ne.s32.totalorder %s5308_s30, %s6161_s20 }
0x12a6   :  { %6135 = vpow2.f32 %v3742_v31  ;;  %3754 = vadd.xlane.f32.xlu1 %v3753_v36 }
0x12a7   :  { %6137 = vpow2.f32 %v3740_v34 }
0x12a8   :  { %v6853_v37 = vpop.eup %6131  ;;  %6139 = vpow2.f32 %v3736_v33 }
0x12a9   :  { %v3750_v38 = vsel %vm920_vm14, %v6853_v37, 0.0 }
0x12aa   :  { %3751 = vadd.xlane.f32.xlu0 %v3750_v38 }
0x12ac   :  { %v6857_v40 = vpop.eup %6133 }
0x12ad   :  { %v3759_v41 = vsel %vm920_vm14, %v6857_v40, 0.0 }
0x12ae   :  { %3760 = vadd.xlane.f32.xlu1 %v3759_v41 }
0x12b0   :  { %v6861_v42 = vpop.eup %6135 }
0x12b1   :  { %v6863_v43 = vpop.eup %6137  ;;  %v3765_v45 = vsel %vm920_vm14, %v6861_v42, 0.0 }
0x12b2   :  { %3766 = vadd.xlane.f32.xlu1 %v3765_v45  ;;  %v3762_v46 = vsel %vm920_vm14, %v6863_v43, 0.0  ;;  %v6869_v47 = vpop.eup %6139 }
0x12b3   :  { %3763 = vadd.xlane.f32.xlu0 %v3762_v46  ;;  %v3756_v48 = vsel %vm920_vm14, %v6869_v47, 0.0 }
0x12b7   :  { %3757 = vadd.xlane.f32.xlu0 %v3756_v48 }
0x12c3   :  { %4102 = vperm.xlu1 %6052, %v5440_v49  }
0x12c7   :  { %4228 = vperm.xlu1 %6052, %v5442_v23  }
0x12cb   :  { %4246 = vperm.xlu1 %6052, %v5446_v50  }
0x12cd   :  { %3085 = vperm.xlu0 %6051, %v5411_v51  }
0x12cf   :  { %4343 = vperm.xlu1 %6052, %v5451_v52  }
0x12d1   :  { %4234 = vperm.xlu0 %6051, %v5443_v53  }
0x12d3   :  { %4453 = vperm.xlu1 %6052, %v5454_v54  }
0x12d5   :  { %4251 = vperm.xlu0 %6051, %v5447_v55   ;;  %v5439_v55 = vld [vmem:[%s7178_s29 + $0x10] sm:$0xff] }
0x12d7   :  { %4541 = vperm.xlu1 %6052, %v4533_v56   ;;  %v5444_v56 = vld [vmem:[%s7132_s15 + $0x20] sm:$0xff] }
0x12d9   :  { %4447 = vperm.xlu0 %6051, %v5453_v58  }
0x12db   :  { %5197 = vperm.xlu1 %6052, %v5188_v60  }
0x12dd   :  { %4536 = vperm.xlu0 %6051, %v4532_v57  }
0x12df   :  { %5215 = vperm.xlu1 %6052, %v5212_v62  }
0x12e1   :  { %5192 = vperm.xlu0 %6051, %v5187_v61  }
0x12e5   :  { %5202 = vperm.xlu0 %6051, %v5189_v2  }
0x132f   :  { %v3749_v1 = vpop.xlane.xlu1 %3748 }
0x1330   :  { %6141 = vrcp.f32 %v3749_v1  ;;  %v3746_v44 = vpop.xlane.xlu0 %3745 }
0x1331   :  { %6143 = vrcp.f32 %v3746_v44 }
0x1333   :  { %v3755_v6 = vpop.xlane.xlu1 %3754 }
0x1334   :  { %6145 = vrcp.f32 %v3755_v6 }
0x1337   :  { %v3752_v7 = vpop.xlane.xlu0 %3751 }
0x1338   :  { %6147 = vrcp.f32 %v3752_v7 }
0x133a   :  { %v6142_v8 = vpop.eup %6141 }
0x133b   :  { %v6144_v10 = vpop.eup %6143  ;;  %v3777_v11 = vmul.f32 %v6142_v8, %v6841_v20  ;;  %v3761_v63 = vpop.xlane.xlu1 %3760 }
0x133c   :  { %v3776_v12 = vmul.f32 %v6144_v10, %v6843_v22 }
0x133e   :  { %v6002_v0 = vpack.c.bf16 %v3777_v11, %v3776_v12  ;;  %v6146_v15 = vpop.eup %6145 }
0x133f   :  { %v3767_v13 = vpop.xlane.xlu1 %3766  ;;  %v3779_v21 = vmul.f32 %v6146_v15, %v6849_v30 }
0x1340   :  { %6149 = vrcp.f32 %v3767_v13  ;;  %6004 = vmatpush3.bf16.xpose.msk.msra.mxu1 %vm6530_vm15, %v6002_v0  ;;  %v3764_v17 = vpop.xlane.xlu0 %3763 }
0x1341   :  { %6151 = vrcp.f32 %v3764_v17  ;;  %6009 = vmatprep.subr.bf16.mxu1 %v6189_v16 }
0x1342   :  { %v6148_v19 = vpop.eup %6147  ;;  %6153 = vrcp.f32 %v3761_v63 }
0x1343   :  { %v3778_v24 = vmul.f32 %v6148_v19, %v6853_v37 }
0x1344   :  { %v3758_v20 = vpop.xlane.xlu0 %3757 }
0x1345   :  { %6155 = vrcp.f32 %v3758_v20  ;;  %v6006_v22 = vpack.c.bf16 %v3779_v21, %v3778_v24 }
0x1347   :  { %6008 = vmatpush3.bf16.xpose.msk.msra.mxu0 %vm6530_vm15, %v6006_v22 }
0x1348   :  { %6013 = vmatprep.subr.bf16.mxu0 %v6189_v16 }
0x134a   :  { %v6150_v18 = vpop.eup %6149 }
0x134b   :  { %v6152_v25 = vpop.eup %6151  ;;  %v3783_v29 = vmul.f32 %v6150_v18, %v6861_v42 }
0x134c   :  { %v3086_v26 = vpop.permute.xlu0 %3085  ;;  %v6154_v27 = vpop.eup %6153  ;;  %v3782_v30 = vmul.f32 %v6152_v25, %v6863_v43 }
0x134d   :  { %v3174_v28 = vadd.f32 %v6823_v35, %v3086_v26  ;;  %v3781_v34 = vmul.f32 %v6154_v27, %v6857_v40 }
0x134e   :  { %v6014_v41 = vpack.c.bf16 %v3783_v29, %v3782_v30 }
0x134f   :  { %v6156_v31 = vpop.eup %6155  ;;  %v3226_v33 = vrot.slane %v3174_v28, %v6405_v32  ;;  %v3219_v37 = vcombine.high %v3174_v28, %v3174_v28  ;;  %v5445_v28 = vld [vmem:[%s7132_s15 + $0x28] sm:$0xff] }
0x1350   :  { %v3780_v36 = vmul.f32 %v6156_v31, %v6869_v47  ;;  %v4235_v26 = vpop.permute.xlu0 %4234 }
0x1351   :  { %v3234_v38 = vcombine.high %v3226_v33, %v3226_v33  ;;  %5832 = vmatmul.mubr.msk.f32.vlgmr.msra.gmra.mrb[36].mxu1 %vm920_vm14, %v3226_v33  ;;  %v3233_v35 = vrot.slane %v3219_v37, %v6405_v32 }
0x1352   :  { %v6010_v45 = vpack.c.bf16 %v3781_v34, %v3780_v36  ;;  %5845 = vmatprep.mubr.msk.f32.mxu1 %vm6187_vm0, %v6185_v3 }
0x1353   :  { %5839 = vmatmul.mubr.msk.f32.vlgmr.msra.gmra.mrb[38].mxu0 %vm920_vm14, %v3234_v38  ;;  %v3235_v40 = vcombine.high %v3233_v35, %v3233_v35 }
0x1354   :  { %6016 = vmatpush3.bf16.xpose.msk.msra.mxu0 %vm6530_vm15, %v6014_v41  ;;  %6012 = vmatpush3.bf16.xpose.msk.msra.mxu1 %vm6530_vm15, %v6010_v45  ;;  %v4252_v29 = vpop.permute.xlu0 %4251  ;;  %v5450_v45 = vld [vmem:[%s7134_s17 + $0x10] sm:$0xff] }
0x1355   :  { %5852 = vmatprep.mubr.msk.f32.mxu0 %vm6187_vm0, %v6185_v3  ;;  %5855 = vmatprep.subr.mxu1 %v6185_v3 }
0x135b   :  { %5853 = vmatmul.mubr.msk.f32.vlgmr.msra.gmra.mrb[40].mxu0 %vm920_vm14, %v3235_v40  ;;  %5846 = vmatmul.mubr.msk.f32.vlgmr.msra.gmra.mrb[38].mxu1 %vm920_vm14, %v3233_v35  ;;  %v6190_v35 = vmov 1.0|1.0  }
0x135c   :  { %5857 = vmatprep.mubr.msk.f32.mxu1 %vm6187_vm0, %v6185_v3  ;;  %5862 = vmatprep.mubr.msk.f32.mxu0 %vm309_vm11, %v5444_v56 }
0x1424   :  { %v3858_v42 = vpop.f32.mrb[36].mxu1 }
0x1425   :  { %v5833_v43 = vpop.f32.mrb[37].mxu1 }
0x1426   :  { %v3936_v46 = vpop.f32.mrb[38].mxu0 }
0x1427   :  { %v4109_v39 = vcombine.low %v3858_v42, %v3936_v46  ;;  %v5840_v47 = vpop.f32.mrb[39].mxu0 }
0x1429   :  { %v4117_v52 = vrot.slane %v4109_v39, %v6405_v32 }
0x142e   :  { %v4092_v48 = vpop.f32.mrb[40].mxu0  ;;  %v4014_v49 = vpop.f32.mrb[38].mxu1 }
0x142f   :  { %v4110_v23 = vcombine.low %v4014_v49, %v4092_v48  ;;  %v5854_v50 = vpop.f32.mrb[41].mxu0  ;;  %v5847_v51 = vpop.f32.mrb[39].mxu1 }
0x1431   :  { %v4124_v53 = vrot.slane %v4110_v23, %v6405_v32  ;;  %v4103_v32 = vpop.permute.xlu1 %4102 }
0x1433   :  { %v4125_v54 = vcombine.low %v4117_v52, %v4124_v53 }
0x1435   :  { %5856 = vmatpush3.msra.mxu1 %v4125_v54  ;;  %v4229_v18 = vpop.permute.xlu1 %4228 }
0x1436   :  { %5858 = vmatmul.mubr.msk.f32.vlgmr.msra.gmra.mrb[40].mxu1 %vm309_vm11, %v5439_v55  ;;  %6017 = vmatprep.subr.bf16.mxu1 %v6189_v16 }
0x1437   :  { %5869 = vmatprep.mubr.msk.f32.mxu1 %vm6187_vm0, %v6185_v3 }
0x1439   :  { %v4247_v31 = vpop.permute.xlu1 %4246 }
0x143d   :  { %v4344_v40 = vpop.permute.xlu1 %4343 }
0x1509   :  { %v4196_v58 = vpop.f32.mrb[40].mxu1 }
0x150a   :  { %v4197_v60 = vadd.f32 %v4196_v58, %v4103_v32  ;;  %v5859_v57 = vpop.f32.mrb[41].mxu1 }
0x150c   :  { %v4200_v62 = vadd.f32 %v4197_v60, %v6778_v59 }
0x150e   :  { %v4205_v61 = vsel %vm920_vm14, %v4200_v62, 0.0 }
0x150f   :  { %v4206_v2 = vrot.slane %v4205_v61, 4 }
0x1511   :  { %v4207_v1 = vadd.f32 %v4206_v2, %v4205_v61 }
0x1513   :  { %v4208_v44 = vrot.slane %v4207_v1, 2 }
0x1515   :  { %v4209_v6 = vadd.f32 %v4208_v44, %v4207_v1 }
0x1517   :  { %v4210_v7 = vrot.slane %v4209_v6, 1 }
0x1519   :  { %v4211_v8 = vadd.f32 %v4210_v7, %v4209_v6  ;;  %v4448_v6 = vpop.permute.xlu0 %4447 }
0x151b   :  { %v4212_v10 = vmul.f32 0.125, %v4211_v8  ;;  %v4454_v8 = vpop.permute.xlu1 %4453 }
0x151d   :  { %v4213_v11 = vsub.f32 %v4200_v62, %v4212_v10 }
0x151f   :  { %v4214_v63 = vmul.f32 %v4213_v11, %v4213_v11 }
0x1521   :  { %v4215_v12 = vsel %vm920_vm14, %v4214_v63, 0.0 }
0x1522   :  { %v4216_v0 = vrot.slane %v4215_v12, 4 }
0x1524   :  { %v4217_v13 = vadd.f32 %v4216_v0, %v4215_v12  ;;  %v4531_v12 = vld [vmem:[%s7136_s19 + $0x8] sm:$0xff] }
0x1526   :  { %v4218_v15 = vrot.slane %v4217_v13, 2 }
0x1528   :  { %v4219_v17 = vadd.f32 %v4218_v15, %v4217_v13  ;;  %v110_v13 = vmul.u32 2, %v6346_v5  ;;  %v112_v15 = vmul.u32 2, %v6353_v9 }
0x152a   :  { %v4220_v19 = vrot.slane %v4219_v17, 1  ;;  %vm111_vm2 = vcmp.ge.s32.totalorder %v6344_v4, %v110_v13  ;;  %vm113_vm3 = vcmp.lt.s32.totalorder %v6344_v4, %v112_v15  ;;  %v5211_v15 = vld [vmem:[%s7143_s26] sm:$0x1] }
0x152b   :  { %vm114_vm4 = vmand %vm111_vm2, %vm113_vm3 }
0x152c   :  { %v4221_v21 = vadd.f32 %v4220_v19, %v4219_v17  ;;  %v5317_v17 = vsel %vm114_vm4, 1.0, %v6185_v3  ;;  %v4542_v19 = vpop.permute.xlu1 %4541 }
0x152e   :  { %v4222_v59 = vmul.f32 0.125, %v4221_v21 }
0x1530   :  { %v4223_v24 = vadd.f32 1e-05, %v4222_v59  ;;  %v4537_v59 = vpop.permute.xlu0 %4536 }
0x1532   :  { %6157 = vrsqrt.f32 %v4223_v24 }
0x153c   :  { %v6158_v20 = vpop.eup %6157 }
0x153d   :  { %v4225_v22 = vmul.f32 %v6158_v20, %v4213_v11  ;;  %v4530_v11 = vld [vmem:[%s7136_s19] sm:$0xff] }
0x153f   :  { %v4231_v25 = vmul.f32 %v4229_v18, %v4225_v22  ;;  %v5000_v18 = vld [vmem:[%s7179_s2] sm:$0x3f] }
0x1541   :  { %v4237_v27 = vadd.f32 %v4235_v26, %v4231_v25  ;;  %v4997_v25 = vld [vmem:[%s7141_s24] sm:$0xff] }
0x1542   :  { %v4996_v26 = vld [vmem:[%s7180_s14] sm:$0x3] }
0x1543   :  { %5860 = vmatprep.subr.mxu0 %v4237_v27 }
0x1544   :  { %5861 = vmatpush3.msra.mxu0 %v4237_v27 }
0x1545   :  { %5863 = vmatmul.mubr.msk.f32.vlgmr.msra.gmra.mrb[42].mxu0 %vm309_vm11, %v5445_v28  ;;  %6020 = vmatprep.subr.bf16.mxu0 %v6189_v16  ;;  %v4999_v28 = vld [vmem:[%s7141_s24 + $0x10] sm:$0xf] }
0x1546   :  { %5876 = vmatprep.mubr.msk.f32.mxu0 %vm6187_vm0, %v6185_v3  ;;  %6022 = vmatpush3.bf16.msk.msra.mxu0 %vm6365_vm9, %v6190_v35  ;;  %v4712_v35 = vld [vmem:[%s7138_s21 + $0x8] sm:$0xff] }
0x1547   :  { %5884 = vmatprep.subr.msk.mxu0 %vm214_vm10, %v5317_v17 }
0x1618   :  { %v5864_v30 = vpop.f32.mrb[42].mxu0 }
0x1619   :  { %v4332_v33 = vadd.f32 %v5864_v30, %v4252_v29  ;;  %v4326_v34 = vpop.f32.mrb[43].mxu0 }
0x161a   :  { %v4327_v36 = vadd.f32 %v4326_v34, %v4247_v31  ;;  %v4714_v31 = vld [vmem:[%s7181_s25] sm:$0xff] }
0x161b   :  { %v4336_v37 = vmax.f32 %v4332_v33, 0.0  ;;  %v4715_v33 = vld [vmem:[%s7181_s25 + $0x8] sm:$0xff]  ;;  %s6165_s25 = scalar_lea.vmem %s5308_s30, 32 }
0x161c   :  { %v4335_v38 = vmax.f32 %v4327_v36, 0.0  ;;  %v4716_v36 = vld [vmem:[%s7139_s22] sm:$0xff]  ;;  %p6167_p2 = scmp.lt.s32.totalorder %s6165_s25, %s6161_s20 }
0x161e   :  { %v6018_v41 = vpack.c.bf16 %v4336_v37, %v4335_v38  ;;  %v6027_v37 = vpack.c.bf16 %v4715_v33, %v4714_v31  ;;  %v4717_v38 = vld [vmem:[%s7139_s22 + $0x8] sm:$0xff]  ;;  %p6168_p3 = por %p6167_p2, %p6166_p1 }
0x1620   :  { %6019 = vmatpush3.bf16.msra.mxu1 %v6018_v41  ;;  %v4711_v41 = vld [vmem:[%s7138_s21] sm:$0xff]  ;;  %p6169_p4 = pnand %p6168_p3, %p6162_p0 }
0x1623   :  { %5870 = vmatmul.mubr.msk.f32.vlgmr.msra.gmra.mrb[42].mxu1 %vm920_vm14, %v5450_v45  ;;  %v4900_v45 = vld [vmem:[%s7182_s10] sm:$0xf] }
0x1624   :  { %5881 = vmatprep.mubr.msk.f32.mxu1 %vm309_vm11, %v4530_v11 }
0x16f6   :  { %v4415_v42 = vpop.f32.mrb[42].mxu1 }
0x16f7   :  { %v4416_v43 = vadd.f32 %v4415_v42, %v4344_v40  ;;  %v5871_v46 = vpop.f32.mrb[43].mxu1  ;;  %v4713_v40 = vld [vmem:[%s7138_s21 + $0x10] sm:$0xf]  ;;  %v4897_v42 = vld [vmem:[%s7140_s23] sm:$0xff] }
0x16f8   :  { %v4899_v46 = vld [vmem:[%s7140_s23 + $0x10] sm:$0xf] }
0x16f9   :  { %v4419_v39 = vadd.f32 %v4416_v43, %v4237_v27  ;;  %v4998_v27 = vld [vmem:[%s7141_s24 + $0x8] sm:$0xff] }
0x16fa   :  { %v4898_v43 = vld [vmem:[%s7140_s23 + $0x8] sm:$0xff] }
0x16fb   :  { %v4424_v47 = vsel %vm920_vm14, %v4419_v39, 0.0 }
0x16fc   :  { %v4425_v48 = vrot.slane %v4424_v47, 4 }
0x16fe   :  { %v4426_v49 = vadd.f32 %v4425_v48, %v4424_v47 }
0x1700   :  { %v4427_v23 = vrot.slane %v4426_v49, 2 }
0x1702   :  { %v4428_v50 = vadd.f32 %v4427_v23, %v4426_v49 }
0x1704   :  { %v4429_v51 = vrot.slane %v4428_v50, 1 }
0x1706   :  { %v4430_v52 = vadd.f32 %v4429_v51, %v4428_v50 }
0x1708   :  { %v4431_v53 = vmul.f32 0.125, %v4430_v52 }
0x170a   :  { %v4432_v54 = vsub.f32 %v4419_v39, %v4431_v53 }
0x170c   :  { %v4433_v55 = vmul.f32 %v4432_v54, %v4432_v54 }
0x170e   :  { %v4434_v56 = vsel %vm920_vm14, %v4433_v55, 0.0 }
0x170f   :  { %v4435_v14 = vrot.slane %v4434_v56, 4 }
0x1711   :  { %v4436_v32 = vadd.f32 %v4435_v14, %v4434_v56 }
0x1713   :  { %v4437_v58 = vrot.slane %v4436_v32, 2 }
0x1715   :  { %v4438_v60 = vadd.f32 %v4437_v58, %v4436_v32 }
0x1717   :  { %v4439_v57 = vrot.slane %v4438_v60, 1 }
0x1719   :  { %v4440_v62 = vadd.f32 %v4439_v57, %v4438_v60  ;;  %v5193_v60 = vpop.permute.xlu0 %5192 }
0x171b   :  { %v4441_v61 = vmul.f32 0.125, %v4440_v62 }
0x171d   :  { %v4442_v2 = vadd.f32 1e-05, %v4441_v61 }
0x171f   :  { %6159 = vrsqrt.f32 %v4442_v2 }
0x1729   :  { %v6160_v1 = vpop.eup %6159 }
0x172a   :  { %v4444_v44 = vmul.f32 %v6160_v1, %v4432_v54  ;;  %v5198_v1 = vpop.permute.xlu1 %5197 }
0x172c   :  { %v4450_v7 = vmul.f32 %v4448_v6, %v4444_v44 }
0x172e   :  { %v4456_v10 = vadd.f32 %v4454_v8, %v4450_v7 }
0x1730   :  { %5877 = vmatmul.mubr.msk.f32.vlgmr.msra.gmra.mrb[44].mxu0 %vm920_vm14, %v4456_v10 }
0x1731   :  { %5885 = vmatpush3.msk.msra.mxu0 %vm214_vm10, %v5317_v17  ;;  %v5220_v17 = vsub.s32 0, %v6344_v4 }
0x1732   :  { %5926 = vmatprep.subr.mxu0 %v6185_v3 }
0x1803   :  { %v4526_v63 = vpop.f32.mrb[44].mxu0 }
0x1804   :  { %v5878_v0 = vpop.f32.mrb[45].mxu0  ;;  %5879 = vmatprep.subr.mxu1 %v4526_v63 }
0x1805   :  { %5880 = vmatpush3.msra.mxu1 %v4526_v63  ;;  %v5203_v63 = vpop.permute.xlu0 %5202 }
0x1806   :  { %5882 = vmatmul.mubr.msk.f32.vlgmr.msra.gmra.mrb[44].mxu1 %vm309_vm11, %v4531_v12  ;;  %6023 = vmatprep.subr.bf16.mxu1 %v6189_v16 }
0x1807   :  { %5893 = vmatprep.mubr.msk.f32.mxu1 %vm6187_vm0, %v6185_v3 }
0x18d9   :  { %v5883_v21 = vpop.f32.mrb[44].mxu1 }
0x18da   :  { %v4622_v24 = vadd.f32 %v5883_v21, %v4542_v19  ;;  %v4616_v5 = vpop.f32.mrb[45].mxu1  ;;  %v5216_v19 = vpop.permute.xlu1 %5215 }
0x18db   :  { %v4617_v20 = vadd.f32 %v4616_v5, %v4537_v59  ;;  %v5221_v21 = vrot.slane %v5216_v19, %v5220_v17 }
0x18dc   :  { %v4626_v22 = vmax.f32 %v4622_v24, 0.0 }
0x18dd   :  { %v4625_v9 = vmax.f32 %v4617_v20, 0.0 }
0x18df   :  { %5886 = vmatprep.mubr.msk.f32.mxu0 %vm117_vm1, %v4625_v9 }
0x18e0   :  { %5887 = vmatmul.mubr.msk.f32.vlgmr.msra.gmra.mrb[46].mxu0 %vm117_vm1, %v4626_v22 }
0x18e1   :  { %5928 = vmatprep.mubr.msk.f32.mxu0 %vm6187_vm0, %v6185_v3  ;;  %5927 = vmatpush3.msk.msra.mxu0 %vm5011_vm5, %v5000_v18 }
0x18e2   :  { %5937 = vmatprep.subr.mxu0 %v6185_v3 }
0x18e4   :  { %5929 = vmatmul.mubr.msk.f32.vlgmr.msra.gmra.mrb[48].mxu0 %vm5001_vm6, %v4997_v25 }
0x18e5   :  { %5931 = vmatprep.mubr.msk.f32.mxu0 %vm6187_vm0, %v6185_v3  ;;  %5938 = vmatpush3.msk.msra.mxu0 %vm497_vm12, %v4996_v26 }
0x18e6   :  { %6029 = vmatprep.subr.bf16.mxu0 %v6189_v16 }
0x18e8   :  { %5932 = vmatmul.mubr.msk.f32.gmra.mrb[50].mxu0 %vm5001_vm6, %v4998_v27 }
0x18e9   :  { %5934 = vmatprep.mubr.msk.f32.mxu0 %vm6187_vm0, %v6185_v3 }
0x18ec   :  { %5935 = vmatmul.mubr.msk.f32.gmra.mrb[52].mxu0 %vm5001_vm6, %v4999_v28 }
0x18ed   :  { %5939 = vmatprep.mubr.msk.f32.mxu0 %vm6187_vm0, %v6185_v3 }
0x19b3   :  { %v5888_v29 = vpop.f32.mrb[46].mxu0 }
0x19b4   :  { %v4702_v30 = vpop.f32.mrb[47].mxu0 }
0x19b5   :  { %v6024_v34 = vpack.c.bf16 %v5888_v29, %v4702_v30 }
0x19b7   :  { %6025 = vmatpush3.bf16.msra.mxu1 %v6024_v34  ;;  %v5081_v39 = vpop.f32.mrb[48].mxu0 }
0x19b8   :  { %6026 = vmatprep.subr.bf16.mxu1 %v6189_v16  ;;  %v4718_v16 = vld [vmem:[%s7139_s22 + $0x10] sm:$0xf]  ;;  %v5930_v47 = vpop.f32.mrb[49].mxu0 }
0x19ba   :  { %5894 = vmatmul.mubr.msk.f32.vlgmr.msra.gmra.mrb[46].mxu1 %vm920_vm14, %v4716_v36 }
0x19bb   :  { %5896 = vmatprep.mubr.msk.f32.mxu1 %vm6187_vm0, %v6185_v3  ;;  %6028 = vmatpush3.bf16.msra.mxu1 %v6027_v37  ;;  %v5086_v48 = vpop.f32.mrb[50].mxu0 }
0x19bc   :  { %5915 = vmatprep.subr.mxu1 %v6185_v3  ;;  %v5933_v49 = vpop.f32.mrb[51].mxu0 }
0x19be   :  { %5897 = vmatmul.mubr.msk.f32.gmra.mrb[48].mxu1 %vm920_vm14, %v4717_v38 }
0x19bf   :  { %5899 = vmatprep.mubr.msk.f32.mxu1 %vm6187_vm0, %v6185_v3  ;;  %v5091_v23 = vpop.f32.mrb[52].mxu0 }
0x19c0   :  { %v5936_v50 = vpop.f32.mrb[53].mxu0 }
0x19c2   :  { %5900 = vmatmul.mubr.msk.f32.gmra.mrb[50].mxu1 %vm920_vm14, %v4718_v16 }
0x19c3   :  { %5906 = vmatprep.mubr.msk.f32.mxu1 %vm6187_vm0, %v6185_v3 }
0x19c6   :  { %5907 = vmatmul.mubr.msk.f32.vlgmr.msra.gmra.mrb[46].mxu1 %vm920_vm14, %v4711_v41 }
0x19c7   :  { %5909 = vmatprep.mubr.msk.f32.mxu1 %vm6187_vm0, %v6185_v3  ;;  %5916 = vmatpush3.msk.msra.mxu1 %vm214_vm10, %v4900_v45 }
0x19ca   :  { %5910 = vmatmul.mubr.msk.f32.gmra.mrb[48].mxu1 %vm920_vm14, %v4712_v35 }
0x19cb   :  { %5912 = vmatprep.mubr.msk.f32.mxu1 %vm6187_vm0, %v6185_v3 }
0x19ce   :  { %5913 = vmatmul.mubr.msk.f32.gmra.mrb[50].mxu1 %vm920_vm14, %v4713_v40 }
0x19cf   :  { %5917 = vmatprep.mubr.msk.f32.mxu1 %vm6187_vm0, %v6185_v3 }
0x19d2   :  { %5918 = vmatmul.mubr.msk.f32.vlgmr.msra.gmra.mrb[46].mxu1 %vm117_vm1, %v4897_v42 }
0x19d3   :  { %5920 = vmatprep.mubr.msk.f32.mxu1 %vm6187_vm0, %v6185_v3 }
0x19d6   :  { %5921 = vmatmul.mubr.msk.f32.gmra.mrb[48].mxu1 %vm117_vm1, %v4898_v43 }
0x19d7   :  { %5923 = vmatprep.mubr.msk.f32.mxu1 %vm6187_vm0, %v6185_v3 }
0x19da   :  { %5924 = vmatmul.mubr.msk.f32.gmra.mrb[50].mxu1 %vm117_vm1, %v4899_v46  ;;  %vm5299_vm1 = vcmask 32768  }
0x1aa5   :  { %v4979_v51 = vpop.f32.mrb[46].mxu1 }
0x1aa6   :  { %v5919_v52 = vpop.f32.mrb[47].mxu1  ;;  %5940 = vmatmul.mubr.msk.f32.vlgmr.msra.gmra.mrb[54].mxu0 %vm490_vm13, %v4979_v51 }
0x1aa7   :  { %5942 = vmatprep.mubr.msk.f32.mxu0 %vm6187_vm0, %v6185_v3 }
0x1aa9   :  { %v4984_v53 = vpop.f32.mrb[48].mxu1 }
0x1aaa   :  { %v5922_v54 = vpop.f32.mrb[49].mxu1  ;;  %5943 = vmatmul.mubr.msk.f32.gmra.mrb[56].mxu0 %vm490_vm13, %v4984_v53 }
0x1aab   :  { %5945 = vmatprep.mubr.msk.f32.mxu0 %vm6187_vm0, %v6185_v3 }
0x1aad   :  { %v4989_v55 = vpop.f32.mrb[50].mxu1 }
0x1aae   :  { %v5925_v56 = vpop.f32.mrb[51].mxu1  ;;  %5946 = vmatmul.mubr.msk.f32.gmra.mrb[58].mxu0 %vm490_vm13, %v4989_v55 }
0x1aaf   :  { %5954 = vmatprep.mubr.msk.f32.mxu0 %vm6187_vm0, %v6185_v3  ;;  %vm5222_vm0 = vcmask 162816  }
0x1b79   :  { %v5173_v14 = vpop.f32.mrb[54].mxu0 }
0x1b7a   :  { %v5174_v32 = vadd.f32 %v5173_v14, %v5081_v39  ;;  %v5941_v58 = vpop.f32.mrb[55].mxu0 }
0x1b7c   :  { %v5205_v62 = vadd.f32 %v5193_v60, %v5174_v32 }
0x1b7d   :  { %v5178_v57 = vpop.f32.mrb[56].mxu0 }
0x1b7e   :  { %v5179_v61 = vadd.f32 %v5178_v57, %v5086_v48  ;;  %v5944_v2 = vpop.f32.mrb[57].mxu0  ;;  %v5208_v7 = vmax.f32 %v5205_v62, 0.0 }
0x1b80   :  { %v5206_v44 = vadd.f32 %v5198_v1, %v5179_v61 }
0x1b81   :  { %v5183_v6 = vpop.f32.mrb[58].mxu0 }
0x1b82   :  { %v5209_v8 = vmax.f32 %v5206_v44, 0.0  ;;  %v5184_v10 = vadd.f32 %v5183_v6, %v5091_v23  ;;  %v5947_v11 = vpop.f32.mrb[59].mxu0 }
0x1b84   :  { %v6030_v12 = vpack.c.bf16 %v5209_v8, %v5208_v7  ;;  %v5207_v0 = vadd.f32 %v5203_v63, %v5184_v10 }
0x1b86   :  { %6031 = vmatpush3.bf16.msra.mxu0 %v6030_v12  ;;  %v5210_v13 = vmax.f32 %v5207_v0, 0.0 }
0x1b87   :  { %5952 = vmatprep.subr.mxu0 %v6185_v3 }
0x1b8a   :  { %5953 = vmatpush3.msk.msra.mxu0 %vm214_vm10, %v5210_v13 }
0x1b8b   :  { %5955 = vmatmul.mubr.msk.f32.vlgmr.msra.gmra.mrb[60].mxu0 %vm5222_vm0, %v5211_v15 }
0x1c5e   :  { %v5295_v59 = vpop.f32.mrb[60].mxu0 }
0x1c5f   :  { %v5296_v24 = vadd.f32 %v5295_v59, %v5221_v21  ;;  %v5956_v5 = vpop.f32.mrb[61].mxu0 }
0x1c61   :  { %5300 = vst.msk [vmem:[#allocation3] sm:$0x1] %vm5299_vm1, %v5296_v24 }
0x1c62   :  { %6172 = shalt.err (!%p6169_p4)
}
0x1c63   :  { %s6173_s7 = scalar_lea.hbm %s7145_s28, 16 }
0x1c64   :  { %p6174_p5 = scmp.ne.s32.totalorder %s7145_s28, %s6173_s7  ;;  %p6177_p6 = scmp.lt.u32.totalorder %s6173_s7, %s7145_s28 }
0x1c66   :  { %p6179_p7 = pnand %p6177_p6, %p6174_p5 }
0x1c68   :  { %6182 = shalt.err (!%p6179_p7)
}
0x1c69   :  { %5310 = dma.vmem_to_hbm [thread:$0]  %s5308_s30, 16, %s7145_s28, [#allocation4]  }
0x1c6a   :  { %6183 = dma.done.wait [#allocation4], 16  }
0x1c6b   :  { %6184 = vsyncadd [#allocation4], 4294967280 }
0x1c6c   :  { %5314 = vsyncpa [#allocation4], 1 }

</bundles_post_ra>
